<compile_context>
chip_gen: v7x
topology: tpu7x:2x2x1
jax: 0.10.0
libtpu: 0.0.40
codegen_flags: <defaults>
</compile_context>

<pallas_src>
import jax
import jax.numpy as jnp
from jax.experimental import pallas as pl
from jax.experimental.pallas import tpu as pltpu

OUT_PAD = 128  # lane-dense width for the final 256 -> 1 head


def _round_up(x, m):
    return ((x + m - 1) // m) * m


def _leaky_relu(x, slope=0.2):
    return jnp.where(x > 0, x, slope * x)


def discriminator_kernel(x_ref, w1_ref, b1_ref, w2_ref, b2_ref, w3_ref, b3_ref,
                         o_ref):
    # x: (TM, D) in compute dtype; weights in compute dtype; biases f32.
    x = x_ref[...]
    # Linear 1 + LeakyReLU(0.2) -- MXU accumulates in f32.
    h1 = jnp.dot(x, w1_ref[...], preferred_element_type=jnp.float32) + b1_ref[...]
    h1 = _leaky_relu(h1)
    # Linear 2 + LeakyReLU(0.2)
    h2 = jnp.dot(h1.astype(w2_ref.dtype), w2_ref[...],
                 preferred_element_type=jnp.float32) + b2_ref[...]
    h2 = _leaky_relu(h2)
    # Linear 3 (lane-padded to 128 cols) + Sigmoid (exp + approx recip on EUP)
    logit = jnp.dot(h2.astype(w3_ref.dtype), w3_ref[...],
                    preferred_element_type=jnp.float32) + b3_ref[...]
    o_ref[...] = pl.reciprocal(1.0 + jnp.exp(-logit), approx=True).astype(o_ref.dtype)


def discriminator_forward(img, params, *, compute_dtype=jnp.float32):
    """img: (B, C, H, W) float (NCHW, like PyTorch). Returns (B, 1) float32."""
    w1, b1, w2, b2, w3, b3 = params
    B = img.shape[0]
    x = img.reshape(B, -1)                 # same as PyTorch img.view(B, -1)
    D = x.shape[1]
    H1 = w1.shape[1]
    H2 = w2.shape[1]
    n_out = w3.shape[1]

    # Batch tile: pad B to at least an 8-row (f32 sublane) multiple; use
    # 128-row (MXU-height) tiles once the batch is big enough.
    TM = 128 if B >= 128 else _round_up(B, 8)
    B_pad = _round_up(B, TM)

    # MXU/DMA operands in compute_dtype (bf16 halves HBM traffic and doubles
    # MXU rate on v6e/v7x).  Biases + activation math stay f32.
    x_p = jnp.pad(x.astype(compute_dtype), ((0, B_pad - B), (0, 0)))
    w1c = w1.astype(compute_dtype)
    w2c = w2.astype(compute_dtype)
    # Lane-dense head: zero-pad the 1-wide output layer to 128 columns.
    w3c = jnp.pad(w3.astype(compute_dtype), ((0, 0), (0, OUT_PAD - n_out)))
    b1f = b1.astype(jnp.float32)
    b2f = b2.astype(jnp.float32)
    b3f = jnp.pad(b3.astype(jnp.float32), ((0, 0), (0, OUT_PAD - n_out)))

    # VMEM budget: double-buffered x/out tiles + resident weights + f32
    # intermediates, with margin (explicit so the v7x 32 MiB scoped default
    # does not bite and we never over-ask its 64 MiB physical VMEM needlessly).
    isz = jnp.dtype(compute_dtype).itemsize
    vmem_bytes = (2 * TM * D * isz                                  # x (2-buf)
                  + D * H1 * isz + H1 * H2 * isz + H2 * OUT_PAD * isz
                  + (H1 + H2 + OUT_PAD) * 4                         # biases
                  + 2 * TM * OUT_PAD * 4                            # out (2-buf)
                  + TM * (H1 + H2 + OUT_PAD) * 4)                   # h1/h2/logit
    vmem_limit = min(int(vmem_bytes * 1.5) + (2 << 20), 128 << 20)

    resident = lambda shape: pl.BlockSpec(shape, lambda i: (0,) * len(shape))

    out = pl.pallas_call(
        discriminator_kernel,
        out_shape=jax.ShapeDtypeStruct((B_pad, OUT_PAD), jnp.float32),
        grid_spec=pltpu.PrefetchScalarGridSpec(
            num_scalar_prefetch=0,
            grid=(B_pad // TM,),
            in_specs=[
                pl.BlockSpec((TM, D), lambda i: (i, 0)),  # x: streamed per tile
                resident((D, H1)),                        # w1 (resident)
                resident((1, H1)),                        # b1
                resident((H1, H2)),                       # w2
                resident((1, H2)),                        # b2
                resident((H2, OUT_PAD)),                  # w3 (lane-padded)
                resident((1, OUT_PAD)),                   # b3 (lane-padded)
            ],
            out_specs=pl.BlockSpec((TM, OUT_PAD), lambda i: (i, 0)),
        ),
        compiler_params=pltpu.CompilerParams(
            dimension_semantics=("parallel",),   # independent batch tiles -> dual-TC on v7x
            vmem_limit_bytes=vmem_limit),
    )(x_p, w1c, b1f, w2c, b2f, w3c, b3f)

    # TODO(synk): for real celeba input dims (D ~ 12288+ at f32) add K-tiling of
    # the first layer (grid=(B/TM, D/TK) + f32 accumulator scratch) so W1
    # streams instead of being fully resident on 64 MiB-VMEM parts.
    return out[:B, :n_out]


def init_params(key, in_dim, h1=512, h2=256, out_dim=1):
    """Deterministic synthetic params (shapes match the PyTorch module)."""
    ks = jax.random.split(key, 6)
    scale = lambda fan_in: 1.0 / jnp.sqrt(jnp.float32(fan_in))
    w1 = jax.random.uniform(ks[0], (in_dim, h1), jnp.float32, -1, 1) * scale(in_dim)
    b1 = jax.random.uniform(ks[1], (1, h1), jnp.float32, -1, 1) * scale(in_dim)
    w2 = jax.random.uniform(ks[2], (h1, h2), jnp.float32, -1, 1) * scale(h1)
    b2 = jax.random.uniform(ks[3], (1, h2), jnp.float32, -1, 1) * scale(h1)
    w3 = jax.random.uniform(ks[4], (h2, out_dim), jnp.float32, -1, 1) * scale(h2)
    b3 = jax.random.uniform(ks[5], (1, out_dim), jnp.float32, -1, 1) * scale(h2)
    return (w1, b1, w2, b2, w3, b3)


def _reference_forward(img, params):
    w1, b1, w2, b2, w3, b3 = params
    x = img.reshape(img.shape[0], -1).astype(jnp.float32)
    z1 = x @ w1 + b1
    h1 = jnp.where(z1 > 0, z1, 0.2 * z1)
    z2 = h1 @ w2 + b2
    h2 = jnp.where(z2 > 0, z2, 0.2 * z2)
    return jax.nn.sigmoid(h2 @ w3 + b3)


if __name__ == "__main__":
    # Small shapes consistent with the module: batch=2, channels=4, img_size=16
    B, C, H, W = 2, 4, 16, 16
    in_dim = C * H * W  # 1024

    key = jax.random.PRNGKey(0)
    k_img, k_par = jax.random.split(key)
    img = jax.random.normal(k_img, (B, C, H, W), dtype=jnp.float32)
    params = init_params(k_par, in_dim)

    ref = _reference_forward(img, params)

    # f32 operand path (exact apart from the approx EUP reciprocal in sigmoid).
    out_f32 = jax.block_until_ready(discriminator_forward(img, params))
    assert out_f32.shape == (B, 1), out_f32.shape
    assert jnp.allclose(out_f32, ref, atol=1e-3, rtol=1e-3), (out_f32, ref)

    # bf16 MXU-operand fast path (v6e/v7x); activations/accumulation stay f32.
    out_bf16 = jax.block_until_ready(
        discriminator_forward(img, params, compute_dtype=jnp.bfloat16))
    assert out_bf16.shape == (B, 1), out_bf16.shape
    assert jnp.allclose(out_bf16, ref, atol=3e-2, rtol=5e-2), (out_bf16, ref)

    print("KERNEL_OK")
</pallas_src>

<mosaic_0001>
module attributes {stable_mosaic.version = 11 : i64} {
  func.func @discriminator_kernel(%arg0: i32, %arg1: memref<8x1024xf32, #tpu.memory_space<vmem>>, %arg2: memref<1024x512xf32, #tpu.memory_space<vmem>>, %arg3: memref<1x512xf32, #tpu.memory_space<vmem>>, %arg4: memref<512x256xf32, #tpu.memory_space<vmem>>, %arg5: memref<1x256xf32, #tpu.memory_space<vmem>>, %arg6: memref<256x128xf32, #tpu.memory_space<vmem>>, %arg7: memref<1x128xf32, #tpu.memory_space<vmem>>, %arg8: memref<8x128xf32, #tpu.memory_space<vmem>>) attributes {dimension_semantics = [#tpu.dimension_semantics<parallel>], iteration_bounds = array<i64: 1>, scalar_prefetch = 0 : i64, scratch_operands = 0 : i64, tpu.core_type = #tpu.core_type<tc>, window_params = [{transform_indices = @transform_0, window_bounds = array<i64: 8, 1024>}, {pipeline_mode = #tpu.pipeline_mode<synchronous>, transform_indices = @transform_1, window_bounds = array<i64: 1024, 512>}, {pipeline_mode = #tpu.pipeline_mode<synchronous>, transform_indices = @transform_2, window_bounds = array<i64: 1, 512>}, {pipeline_mode = #tpu.pipeline_mode<synchronous>, transform_indices = @transform_3, window_bounds = array<i64: 512, 256>}, {pipeline_mode = #tpu.pipeline_mode<synchronous>, transform_indices = @transform_4, window_bounds = array<i64: 1, 256>}, {pipeline_mode = #tpu.pipeline_mode<synchronous>, transform_indices = @transform_5, window_bounds = array<i64: 256, 128>}, {pipeline_mode = #tpu.pipeline_mode<synchronous>, transform_indices = @transform_6, window_bounds = array<i64: 1, 128>}, {transform_indices = @transform_7, window_bounds = array<i64: 8, 128>}]} {
    %c0 = arith.constant 0 : index
    %c0_0 = arith.constant 0 : index
    %0 = vector.load %arg1[%c0, %c0_0] : memref<8x1024xf32, #tpu.memory_space<vmem>>, vector<8x1024xf32>
    %c0_1 = arith.constant 0 : index
    %c0_2 = arith.constant 0 : index
    %1 = vector.load %arg2[%c0_1, %c0_2] : memref<1024x512xf32, #tpu.memory_space<vmem>>, vector<1024x512xf32>
    %cst = arith.constant dense<0.000000e+00> : vector<8x512xf32>
    %2 = tpu.matmul %0, %1, %cst {dimension_numbers = #tpu.dot_dimension_numbers<[1], [0], [0], [1], [0, 0, 1, 1], [], []>} : vector<8x1024xf32>, vector<1024x512xf32>, vector<8x512xf32> -> vector<8x512xf32>
    %c0_3 = arith.constant 0 : index
    %c0_4 = arith.constant 0 : index
    %3 = vector.load %arg3[%c0_3, %c0_4] : memref<1x512xf32, #tpu.memory_space<vmem>>, vector<1x512xf32>
    %4 = vector.broadcast %3 : vector<1x512xf32> to vector<8x512xf32>
    %5 = arith.addf %2, %4 : vector<8x512xf32>
    %cst_5 = arith.constant 0.000000e+00 : f32
    %6 = vector.broadcast %cst_5 : f32 to vector<8x512xf32>
    %7 = arith.cmpf ogt, %5, %6 : vector<8x512xf32>
    %cst_6 = arith.constant 2.000000e-01 : f32
    %8 = vector.broadcast %cst_6 : f32 to vector<8x512xf32>
    %9 = arith.mulf %8, %5 : vector<8x512xf32>
    %10 = arith.select %7, %5, %9 : vector<8x512xi1>, vector<8x512xf32>
    %c0_7 = arith.constant 0 : index
    %c0_8 = arith.constant 0 : index
    %11 = vector.load %arg4[%c0_7, %c0_8] : memref<512x256xf32, #tpu.memory_space<vmem>>, vector<512x256xf32>
    %cst_9 = arith.constant dense<0.000000e+00> : vector<8x256xf32>
    %12 = tpu.matmul %10, %11, %cst_9 {dimension_numbers = #tpu.dot_dimension_numbers<[1], [0], [0], [1], [0, 0, 1, 1], [], []>} : vector<8x512xf32>, vector<512x256xf32>, vector<8x256xf32> -> vector<8x256xf32>
    %c0_10 = arith.constant 0 : index
    %c0_11 = arith.constant 0 : index
    %13 = vector.load %arg5[%c0_10, %c0_11] : memref<1x256xf32, #tpu.memory_space<vmem>>, vector<1x256xf32>
    %14 = vector.broadcast %13 : vector<1x256xf32> to vector<8x256xf32>
    %15 = arith.addf %12, %14 : vector<8x256xf32>
    %cst_12 = arith.constant 0.000000e+00 : f32
    %16 = vector.broadcast %cst_12 : f32 to vector<8x256xf32>
    %17 = arith.cmpf ogt, %15, %16 : vector<8x256xf32>
    %cst_13 = arith.constant 2.000000e-01 : f32
    %18 = vector.broadcast %cst_13 : f32 to vector<8x256xf32>
    %19 = arith.mulf %18, %15 : vector<8x256xf32>
    %20 = arith.select %17, %15, %19 : vector<8x256xi1>, vector<8x256xf32>
    %c0_14 = arith.constant 0 : index
    %c0_15 = arith.constant 0 : index
    %21 = vector.load %arg6[%c0_14, %c0_15] : memref<256x128xf32, #tpu.memory_space<vmem>>, vector<256x128xf32>
    %cst_16 = arith.constant dense<0.000000e+00> : vector<8x128xf32>
    %22 = tpu.matmul %20, %21, %cst_16 {dimension_numbers = #tpu.dot_dimension_numbers<[1], [0], [0], [1], [0, 0, 1, 1], [], []>} : vector<8x256xf32>, vector<256x128xf32>, vector<8x128xf32> -> vector<8x128xf32>
    %c0_17 = arith.constant 0 : index
    %c0_18 = arith.constant 0 : index
    %23 = vector.load %arg7[%c0_17, %c0_18] : memref<1x128xf32, #tpu.memory_space<vmem>>, vector<1x128xf32>
    %24 = vector.broadcast %23 : vector<1x128xf32> to vector<8x128xf32>
    %25 = arith.addf %22, %24 : vector<8x128xf32>
    %cst_19 = arith.constant 0.000000e+00 : f32
    %26 = vector.broadcast %cst_19 : f32 to vector<8x128xf32>
    %27 = arith.subf %26, %25 : vector<8x128xf32>
    %28 = math.exp %27 : vector<8x128xf32>
    %cst_20 = arith.constant 1.000000e+00 : f32
    %29 = vector.broadcast %cst_20 : f32 to vector<8x128xf32>
    %30 = arith.addf %29, %28 : vector<8x128xf32>
    %31 = tpu.reciprocal %30 {approx = true} : vector<8x128xf32> -> vector<8x128xf32>
    %c0_21 = arith.constant 0 : index
    %c0_22 = arith.constant 0 : index
    %32 = vector.load %arg8[%c0_21, %c0_22] : memref<8x128xf32, #tpu.memory_space<vmem>>, vector<8x128xf32>
    tpu.vector_store %arg8[%c0_21, %c0_22], %31 {strides = array<i32>} : memref<8x128xf32, #tpu.memory_space<vmem>>, vector<8x128xf32>,
    return
  }
  func.func @transform_0(%arg0: i32) -> (i32, i32) {
    %c0_i32 = arith.constant 0 : i32
    %c0_i32_0 = arith.constant 0 : i32
    return %arg0, %c0_i32 : i32, i32
  }
  func.func @transform_1(%arg0: i32) -> (i32, i32) {
    %c0_i32 = arith.constant 0 : i32
    %c0_i32_0 = arith.constant 0 : i32
    %c0_i32_1 = arith.constant 0 : i32
    return %c0_i32, %c0_i32_0 : i32, i32
  }
  func.func @transform_2(%arg0: i32) -> (i32, i32) {
    %c0_i32 = arith.constant 0 : i32
    %c0_i32_0 = arith.constant 0 : i32
    %c0_i32_1 = arith.constant 0 : i32
    return %c0_i32, %c0_i32_0 : i32, i32
  }
  func.func @transform_3(%arg0: i32) -> (i32, i32) {
    %c0_i32 = arith.constant 0 : i32
    %c0_i32_0 = arith.constant 0 : i32
    %c0_i32_1 = arith.constant 0 : i32
    return %c0_i32, %c0_i32_0 : i32, i32
  }
  func.func @transform_4(%arg0: i32) -> (i32, i32) {
    %c0_i32 = arith.constant 0 : i32
    %c0_i32_0 = arith.constant 0 : i32
    %c0_i32_1 = arith.constant 0 : i32
    return %c0_i32, %c0_i32_0 : i32, i32
  }
  func.func @transform_5(%arg0: i32) -> (i32, i32) {
    %c0_i32 = arith.constant 0 : i32
    %c0_i32_0 = arith.constant 0 : i32
    %c0_i32_1 = arith.constant 0 : i32
    return %c0_i32, %c0_i32_0 : i32, i32
  }
  func.func @transform_6(%arg0: i32) -> (i32, i32) {
    %c0_i32 = arith.constant 0 : i32
    %c0_i32_0 = arith.constant 0 : i32
    %c0_i32_1 = arith.constant 0 : i32
    return %c0_i32, %c0_i32_0 : i32, i32
  }
  func.func @transform_7(%arg0: i32) -> (i32, i32) {
    %c0_i32 = arith.constant 0 : i32
    %c0_i32_0 = arith.constant 0 : i32
    return %arg0, %c0_i32 : i32, i32
  }
}

</mosaic_0001>

<bundles_post_ra>
// kernel: tpu_custom_call.1
= control target key start
LH: loop header
LB: loop body
LE: loop exit
PB: predicated region body
PF: predicated region fallthrough
CT: control target
= control target key end

     0   :  { %12 = vsyncpa [#allocation3], 0  ;;  %s2794_s0 = inlined_call_operand.hbm [shape: f32[8,1024], index: 0, kind: input, shape index: {}]   ;;  %s2795_s1 = inlined_call_operand.hbm [shape: f32[1024,512], index: 1, kind: input, shape index: {}]   ;;  %s2796_s2 = inlined_call_operand.hbm [shape: f32[1,512], index: 2, kind: input, shape index: {}]   ;;  %s2797_s3 = inlined_call_operand.hbm [shape: f32[512,256], index: 3, kind: input, shape index: {}]   ;;  %s2798_s4 = inlined_call_operand.hbm [shape: f32[1,256], index: 4, kind: input, shape index: {}]   ;;  %s2799_s5 = inlined_call_operand.hbm [shape: f32[256,128], index: 5, kind: input, shape index: {}]   ;;  %s2800_s6 = inlined_call_operand.hbm [shape: f32[1,128], index: 6, kind: input, shape index: {}]   ;;  %s2801_s7 = inlined_call_operand.hbm [shape: f32[8,128], index: 7, kind: output, shape index: {}]  }
   0x1   :  { %13 = vsyncpa [#allocation6], 0 }
   0x2   :  { %14 = vsyncpa [#allocation9], 0 }
   0x3   :  { %15 = vsyncpa [#allocation12], 0 }
   0x4   :  { %16 = vsyncpa [#allocation4], 0  ;;  %s2590_s24 = smov [#allocation5]   ;;  %s2404_s28 = scalar_lea.hbm %s2795_s1, 65536 }
   0x5   :  { %s32_s25 = sshll.u32 %s2590_s24, 4  ;;  %p2405_p0 = scmp.ne.s32.totalorder %s2795_s1, %s2404_s28  ;;  %s33_s25 = int_to_ptr.vmem [resolvable:$true] %s32_s25 }
   0x6   :  { %p2408_p1 = scmp.lt.u32.totalorder %s2404_s28, %s2795_s1 }
   0x8   :  { %p2410_p2 = pnand %p2408_p1, %p2405_p0 }
   0xa   :  { %2413 = shalt.err (!%p2410_p2)
}
   0xb   :  { %s2414_s10 = scalar_lea.vmem %s33_s25, 65536  ;;  %p2419_p4 = scmp.lt.s32.totalorder %s33_s25, %s33_s25 }
   0xc   :  { %p2415_p3 = scmp.ne.s32.totalorder %s33_s25, %s2414_s10  ;;  %p2420_p5 = scmp.lt.s32.totalorder %s2414_s10, %s2414_s10 }
   0xe   :  { %p2421_p6 = por %p2420_p5, %p2419_p4 }
  0x10   :  { %p2422_p7 = pnand %p2421_p6, %p2415_p3 }
  0x12   :  { %2425 = shalt.err (!%p2422_p7)
}
  0x13   :  { %s2591_s11 = smov 512   ;;  %s2592_s12 = smov 32  }
  0x14   :  { %38 = dma.hbm_to_vmem [thread:$0]  %s2795_s1, 65536, %s33_s25, [#allocation6], %s2591_s11, %s2591_s11, %s2592_s12  }
  0x15   :  { %s2593_s15 = smov [#allocation8]   ;;  %s2426_s19 = scalar_lea.hbm %s2797_s3, 16384 }
  0x16   :  { %s54_s16 = sshll.u32 %s2593_s15, 4  ;;  %p2427_p8 = scmp.ne.s32.totalorder %s2797_s3, %s2426_s19  ;;  %s55_s16 = int_to_ptr.vmem [resolvable:$true] %s54_s16 }
  0x17   :  { %p2430_p9 = scmp.lt.u32.totalorder %s2426_s19, %s2797_s3 }
  0x19   :  { %p2432_p10 = pnand %p2430_p9, %p2427_p8 }
  0x1b   :  { %2435 = shalt.err (!%p2432_p10)
}
  0x1c   :  { %s2436_s24 = scalar_lea.vmem %s55_s16, 16384  ;;  %p2441_p12 = scmp.lt.s32.totalorder %s55_s16, %s55_s16 }
  0x1d   :  { %p2437_p11 = scmp.ne.s32.totalorder %s55_s16, %s2436_s24  ;;  %p2442_p13 = scmp.lt.s32.totalorder %s2436_s24, %s2436_s24 }
  0x1f   :  { %p2443_p0 = por %p2442_p13, %p2441_p12 }
  0x21   :  { %p2444_p1 = pnand %p2443_p0, %p2437_p11 }
  0x23   :  { %2447 = shalt.err (!%p2444_p1)
}
  0x24   :  { %s2594_s1 = smov 256   ;;  %s2595_s25 = smov 16  }
  0x25   :  { %60 = dma.hbm_to_vmem [thread:$0]  %s2797_s3, 16384, %s55_s16, [#allocation9], %s2594_s1, %s2594_s1, %s2595_s25  }
  0x26   :  { %s2596_s28 = smov [#allocation11]   ;;  %s2448_s9 = scalar_lea.hbm %s2799_s5, 4096 }
  0x27   :  { %s76_s29 = sshll.u32 %s2596_s28, 4  ;;  %p2449_p2 = scmp.ne.s32.totalorder %s2799_s5, %s2448_s9  ;;  %s77_s29 = int_to_ptr.vmem [resolvable:$true] %s76_s29 }
  0x28   :  { %p2452_p3 = scmp.lt.u32.totalorder %s2448_s9, %s2799_s5 }
  0x2a   :  { %p2454_p4 = pnand %p2452_p3, %p2449_p2 }
  0x2c   :  { %2457 = shalt.err (!%p2454_p4)
}
  0x2d   :  { %s2458_s14 = scalar_lea.vmem %s77_s29, 4096  ;;  %p2463_p6 = scmp.lt.s32.totalorder %s77_s29, %s77_s29 }
  0x2e   :  { %p2459_p5 = scmp.ne.s32.totalorder %s77_s29, %s2458_s14  ;;  %p2464_p7 = scmp.lt.s32.totalorder %s2458_s14, %s2458_s14 }
  0x30   :  { %p2465_p8 = por %p2464_p7, %p2463_p6 }
  0x32   :  { %p2466_p9 = pnand %p2465_p8, %p2459_p5 }
  0x34   :  { %2469 = shalt.err (!%p2466_p9)
}
  0x35   :  { %s2597_s3 = smov 128   ;;  %s2598_s15 = smov 8  }
  0x36   :  { %82 = dma.hbm_to_vmem [thread:$0]  %s2799_s5, 4096, %s77_s29, [#allocation12], %s2597_s3, %s2597_s3, %s2598_s15  }
  0x37   :  { %s2599_s18 = smov [#allocation2]   ;;  %s2600_s20 = smov [#allocation7]  }
  0x38   :  { %s23_s19 = sshll.u32 %s2599_s18, 4  ;;  %s45_s21 = sshll.u32 %s2600_s20, 4  ;;  %s24_s19 = int_to_ptr.vmem [resolvable:$true] %s23_s19  ;;  %s46_s21 = int_to_ptr.vmem [resolvable:$true] %s45_s21 }
  0x39   :  { %s2470_s24 = scalar_lea.hbm %s2794_s0, 1024 }
  0x3a   :  { %p2471_p10 = scmp.ne.s32.totalorder %s2794_s0, %s2470_s24  ;;  %p2474_p11 = scmp.lt.u32.totalorder %s2470_s24, %s2794_s0 }
  0x3c   :  { %p2476_p12 = pnand %p2474_p11, %p2471_p10 }
  0x3e   :  { %2479 = shalt.err (!%p2476_p12)
}
  0x3f   :  { %s2480_s5 = scalar_lea.vmem %s24_s19, 1024  ;;  %p2485_p0 = scmp.lt.s32.totalorder %s24_s19, %s24_s19 }
  0x40   :  { %p2481_p13 = scmp.ne.s32.totalorder %s24_s19, %s2480_s5  ;;  %p2486_p1 = scmp.lt.s32.totalorder %s2480_s5, %s2480_s5 }
  0x42   :  { %p2487_p2 = por %p2486_p1, %p2485_p0 }
  0x44   :  { %p2488_p3 = pnand %p2487_p2, %p2481_p13 }
  0x46   :  { %2491 = shalt.err (!%p2488_p3)
}
  0x47   :  { %26 = dma.hbm_to_vmem [thread:$0]  %s2794_s0, 1024, %s24_s19, [#allocation3]  }
  0x48   :  { %s2492_s9 = scalar_lea.hbm %s2796_s2, 64 }
  0x49   :  { %p2493_p4 = scmp.ne.s32.totalorder %s2796_s2, %s2492_s9  ;;  %p2496_p5 = scmp.lt.u32.totalorder %s2492_s9, %s2796_s2 }
  0x4b   :  { %p2498_p6 = pnand %p2496_p5, %p2493_p4 }
  0x4d   :  { %2501 = shalt.err (!%p2498_p6)
}
  0x4e   :  { %s2502_s14 = scalar_lea.vmem %s46_s21, 64  ;;  %p2507_p8 = scmp.lt.s32.totalorder %s46_s21, %s46_s21 }
  0x4f   :  { %p2503_p7 = scmp.ne.s32.totalorder %s46_s21, %s2502_s14  ;;  %p2508_p9 = scmp.lt.s32.totalorder %s2502_s14, %s2502_s14 }
  0x51   :  { %p2509_p10 = por %p2508_p9, %p2507_p8 }
  0x53   :  { %p2510_p11 = pnand %p2509_p10, %p2503_p7 }
  0x55   :  { %2513 = shalt.err (!%p2510_p11)
}
  0x56   :  { %48 = dma.hbm_to_vmem [thread:$0]  %s2796_s2, 64, %s46_s21, [#allocation6]  }
  0x57   :  { %s2601_s15 = smov [#allocation10]   ;;  %s2602_s17 = smov [#allocation13]  }
  0x58   :  { %s67_s16 = sshll.u32 %s2601_s15, 4  ;;  %s89_s18 = sshll.u32 %s2602_s17, 4  ;;  %s68_s16 = int_to_ptr.vmem [resolvable:$true] %s67_s16  ;;  %s90_s18 = int_to_ptr.vmem [resolvable:$true] %s89_s18 }
  0x59   :  { %s2514_s22 = scalar_lea.hbm %s2798_s4, 32 }
  0x5a   :  { %p2515_p12 = scmp.ne.s32.totalorder %s2798_s4, %s2514_s22  ;;  %p2518_p13 = scmp.lt.u32.totalorder %s2514_s22, %s2798_s4 }
  0x5c   :  { %p2520_p0 = pnand %p2518_p13, %p2515_p12 }
  0x5e   :  { %2523 = shalt.err (!%p2520_p0)
}
  0x5f   :  { %s2524_s2 = scalar_lea.vmem %s68_s16, 32  ;;  %p2529_p2 = scmp.lt.s32.totalorder %s68_s16, %s68_s16 }
  0x60   :  { %p2525_p1 = scmp.ne.s32.totalorder %s68_s16, %s2524_s2  ;;  %p2530_p3 = scmp.lt.s32.totalorder %s2524_s2, %s2524_s2 }
  0x62   :  { %p2531_p4 = por %p2530_p3, %p2529_p2 }
  0x64   :  { %p2532_p5 = pnand %p2531_p4, %p2525_p1 }
  0x66   :  { %2535 = shalt.err (!%p2532_p5)
}
  0x67   :  { %70 = dma.hbm_to_vmem [thread:$0]  %s2798_s4, 32, %s68_s16, [#allocation9]  }
  0x68   :  { %s2536_s28 = scalar_lea.hbm %s2800_s6, 16 }
  0x69   :  { %p2537_p6 = scmp.ne.s32.totalorder %s2800_s6, %s2536_s28  ;;  %p2540_p7 = scmp.lt.u32.totalorder %s2536_s28, %s2800_s6 }
  0x6b   :  { %p2542_p8 = pnand %p2540_p7, %p2537_p6 }
  0x6d   :  { %2545 = shalt.err (!%p2542_p8)
}
  0x6e   :  { %s2546_s10 = scalar_lea.vmem %s90_s18, 16  ;;  %s2550_s11 = scalar_lea.vmem %s90_s18, 32 }
  0x6f   :  { %p2547_p9 = scmp.ne.s32.totalorder %s90_s18, %s2546_s10  ;;  %p2551_p10 = scmp.lt.s32.totalorder %s90_s18, %s90_s18 }
  0x70   :  { %p2552_p11 = scmp.lt.s32.totalorder %s2550_s11, %s2546_s10 }
  0x72   :  { %p2553_p12 = por %p2552_p11, %p2551_p10 }
  0x74   :  { %p2554_p13 = pnand %p2553_p12, %p2547_p9 }
  0x76   :  { %2557 = shalt.err (!%p2554_p13)
}
  0x77   :  { %92 = dma.hbm_to_vmem [thread:$0]  %s2800_s6, 16, %s90_s18, [#allocation12]  }
  0x78   :  { %2580 = dma.done.wait [#allocation3], 1024  }
  0x79   :  { %2581 = vsyncadd [#allocation3], 4294966272 }
  0x7a   :  { %2582 = dma.done.wait [#allocation6], 65600  }
  0x7b   :  { %2583 = vsyncadd [#allocation6], 4294901696 }
  0x7c   :  { %2584 = dma.done.wait [#allocation9], 16416  }
  0x7d   :  { %2585 = vsyncadd [#allocation9], 4294950880 }
  0x7e   :  { %2586 = dma.done.wait [#allocation12], 4112  }
  0x7f   :  { %2587 = vsyncadd [#allocation12], 4294963184  ;;  %v123_v0 = vld [vmem:[#allocation5 + $0x8] sm:$0xff]  ;;  %v122_v5 = vld [vmem:[#allocation5] sm:$0xff]  ;;  %s2603_s6 = smov [#allocation14]  }
  0x80   :  { %v127_v1 = vld [vmem:[#allocation5 + $0x28] sm:$0xff]  ;;  %v126_v6 = vld [vmem:[#allocation5 + $0x20] sm:$0xff]  ;;  %s1645_s13 = sshll.u32 %s2603_s6, 4  ;;  %s1646_s13 = int_to_ptr.vmem [resolvable:$true] %s1645_s13 }
  0x81   :  { %v251_v2 = vld [vmem:[#allocation5 + $0x408] sm:$0xff]  ;;  %v1693_v3 = vpack.c.bf16 %v127_v1, %v123_v0  ;;  %v1695_v8 = vpack.c.bf16 %v126_v6, %v122_v5  ;;  %v250_v9 = vld [vmem:[#allocation5 + $0x400] sm:$0xff]  ;;  %s2558_s14 = scalar_lea.vmem %s1646_s13, 128  ;;  %p2563_p1 = scmp.lt.s32.totalorder %s1646_s13, %s1646_s13 }
  0x82   :  { %v255_v4 = vld [vmem:[#allocation5 + $0x428] sm:$0xff]  ;;  %v254_v10 = vld [vmem:[#allocation5 + $0x420] sm:$0xff]  ;;  %p2559_p0 = scmp.ne.s32.totalorder %s1646_s13, %s2558_s14  ;;  %p2564_p2 = scmp.lt.s32.totalorder %s2558_s14, %s2558_s14 }
  0x83   :  { %v1757_v7 = vpack.c.bf16 %v255_v4, %v251_v2  ;;  %v131_v11 = vld [vmem:[#allocation5 + $0x48] sm:$0xff]  ;;  %1694 = vmatprep.subr.bf16.mxu1 %v1693_v3  ;;  %v1759_v12 = vpack.c.bf16 %v254_v10, %v250_v9  ;;  %v130_v18 = vld [vmem:[#allocation5 + $0x40] sm:$0xff] }
  0x84   :  { %v135_v13 = vld [vmem:[#allocation5 + $0x68] sm:$0xff]  ;;  %1696 = vmatpush1.bf16.msra.mxu1 %v1695_v8  ;;  %v134_v19 = vld [vmem:[#allocation5 + $0x60] sm:$0xff]  ;;  %p2565_p3 = por %p2564_p2, %p2563_p1 }
  0x85   :  { %v259_v14 = vld [vmem:[#allocation5 + $0x448] sm:$0xff]  ;;  %1758 = vmatprep.subr.bf16.mxu0 %v1757_v7  ;;  %v1697_v16 = vpack.c.bf16 %v135_v13, %v131_v11  ;;  %v258_v20 = vld [vmem:[#allocation5 + $0x440] sm:$0xff]  ;;  %v1699_v21 = vpack.c.bf16 %v134_v19, %v130_v18 }
  0x86   :  { %v263_v15 = vld [vmem:[#allocation5 + $0x468] sm:$0xff]  ;;  %1760 = vmatpush1.bf16.msra.mxu0 %v1759_v12  ;;  %v262_v22 = vld [vmem:[#allocation5 + $0x460] sm:$0xff]  ;;  %p2566_p4 = pnand %p2565_p3, %p2559_p0 }
  0x87   :  { %v1761_v17 = vpack.c.bf16 %v263_v15, %v259_v14  ;;  %v139_v23 = vld [vmem:[#allocation5 + $0x88] sm:$0xff]  ;;  %1698 = vmatprep.subr.bf16.mxu1 %v1697_v16  ;;  %v1763_v25 = vpack.c.bf16 %v262_v22, %v258_v20  ;;  %v138_v29 = vld [vmem:[#allocation5 + $0x80] sm:$0xff] }
  0x88   :  { %v143_v24 = vld [vmem:[#allocation5 + $0xa8] sm:$0xff]  ;;  %v142_v31 = vld [vmem:[#allocation5 + $0xa0] sm:$0xff]  ;;  %1700 = vmatpush1.bf16.msra.mxu1 %v1699_v21 }
  0x89   :  { %1762 = vmatprep.subr.bf16.mxu0 %v1761_v17  ;;  %v1701_v26 = vpack.c.bf16 %v143_v24, %v139_v23  ;;  %v267_v27 = vld [vmem:[#allocation5 + $0x488] sm:$0xff]  ;;  %v266_v32 = vld [vmem:[#allocation5 + $0x480] sm:$0xff]  ;;  %v1703_v34 = vpack.c.bf16 %v142_v31, %v138_v29 }
  0x8a   :  { %v271_v28 = vld [vmem:[#allocation5 + $0x4a8] sm:$0xff]  ;;  %v270_v33 = vld [vmem:[#allocation5 + $0x4a0] sm:$0xff]  ;;  %1764 = vmatpush1.bf16.msra.mxu0 %v1763_v25 }
  0x8b   :  { %v1765_v30 = vpack.c.bf16 %v271_v28, %v267_v27  ;;  %v147_v35 = vld [vmem:[#allocation5 + $0xc8] sm:$0xff]  ;;  %1702 = vmatprep.subr.bf16.mxu1 %v1701_v26  ;;  %v1767_v38 = vpack.c.bf16 %v270_v33, %v266_v32  ;;  %v146_v41 = vld [vmem:[#allocation5 + $0xc0] sm:$0xff] }
  0x8c   :  { %v151_v36 = vld [vmem:[#allocation5 + $0xe8] sm:$0xff]  ;;  %v150_v42 = vld [vmem:[#allocation5 + $0xe0] sm:$0xff]  ;;  %1704 = vmatpush1.bf16.msra.mxu1 %v1703_v34 }
  0x8d   :  { %v275_v37 = vld [vmem:[#allocation5 + $0x4c8] sm:$0xff]  ;;  %v1705_v39 = vpack.c.bf16 %v151_v36, %v147_v35  ;;  %1766 = vmatprep.subr.bf16.mxu0 %v1765_v30  ;;  %v274_v44 = vld [vmem:[#allocation5 + $0x4c0] sm:$0xff]  ;;  %v1707_v50 = vpack.c.bf16 %v150_v42, %v146_v41 }
  0x8e   :  { %v279_v40 = vld [vmem:[#allocation5 + $0x4e8] sm:$0xff]  ;;  %v278_v45 = vld [vmem:[#allocation5 + $0x4e0] sm:$0xff]  ;;  %1768 = vmatpush1.bf16.msra.mxu0 %v1767_v38 }
  0x8f   :  { %v1769_v43 = vpack.c.bf16 %v279_v40, %v275_v37  ;;  %v155_v46 = vld [vmem:[#allocation5 + $0x108] sm:$0xff]  ;;  %1706 = vmatprep.subr.bf16.mxu1 %v1705_v39  ;;  %v1771_v51 = vpack.c.bf16 %v278_v45, %v274_v44  ;;  %v154_v53 = vld [vmem:[#allocation5 + $0x100] sm:$0xff] }
  0x90   :  { %v159_v47 = vld [vmem:[#allocation5 + $0x128] sm:$0xff]  ;;  %v158_v54 = vld [vmem:[#allocation5 + $0x120] sm:$0xff]  ;;  %1708 = vmatpush1.bf16.msra.mxu1 %v1707_v50 }
  0x91   :  { %v283_v48 = vld [vmem:[#allocation5 + $0x508] sm:$0xff]  ;;  %v1709_v52 = vpack.c.bf16 %v159_v47, %v155_v46  ;;  %v282_v55 = vld [vmem:[#allocation5 + $0x500] sm:$0xff]  ;;  %1770 = vmatprep.subr.bf16.mxu0 %v1769_v43  ;;  %v1711_v62 = vpack.c.bf16 %v158_v54, %v154_v53 }
  0x92   :  { %v287_v49 = vld [vmem:[#allocation5 + $0x528] sm:$0xff]  ;;  %v286_v57 = vld [vmem:[#allocation5 + $0x520] sm:$0xff]  ;;  %1772 = vmatpush1.bf16.msra.mxu0 %v1771_v51 }
  0x93   :  { %v1773_v56 = vpack.c.bf16 %v287_v49, %v283_v48  ;;  %v163_v58 = vld [vmem:[#allocation5 + $0x148] sm:$0xff]  ;;  %1710 = vmatprep.subr.bf16.mxu1 %v1709_v52  ;;  %v1775_v63 = vpack.c.bf16 %v286_v57, %v282_v55  ;;  %v162_v1 = vld [vmem:[#allocation5 + $0x140] sm:$0xff] }
  0x94   :  { %v167_v59 = vld [vmem:[#allocation5 + $0x168] sm:$0xff]  ;;  %v166_v2 = vld [vmem:[#allocation5 + $0x160] sm:$0xff]  ;;  %1712 = vmatpush1.bf16.msra.mxu1 %v1711_v62 }
  0x95   :  { %v291_v60 = vld [vmem:[#allocation5 + $0x548] sm:$0xff]  ;;  %v1713_v0 = vpack.c.bf16 %v167_v59, %v163_v58  ;;  %v290_v3 = vld [vmem:[#allocation5 + $0x540] sm:$0xff]  ;;  %1774 = vmatprep.subr.bf16.mxu0 %v1773_v56  ;;  %v1715_v10 = vpack.c.bf16 %v166_v2, %v162_v1 }
  0x96   :  { %v295_v61 = vld [vmem:[#allocation5 + $0x568] sm:$0xff]  ;;  %v294_v5 = vld [vmem:[#allocation5 + $0x560] sm:$0xff]  ;;  %1776 = vmatpush1.bf16.msra.mxu0 %v1775_v63 }
  0x97   :  { %v1777_v4 = vpack.c.bf16 %v295_v61, %v291_v60  ;;  %v171_v6 = vld [vmem:[#allocation5 + $0x188] sm:$0xff]  ;;  %1714 = vmatprep.subr.bf16.mxu1 %v1713_v0  ;;  %v1779_v11 = vpack.c.bf16 %v294_v5, %v290_v3  ;;  %v170_v13 = vld [vmem:[#allocation5 + $0x180] sm:$0xff] }
  0x98   :  { %v175_v7 = vld [vmem:[#allocation5 + $0x1a8] sm:$0xff]  ;;  %v174_v14 = vld [vmem:[#allocation5 + $0x1a0] sm:$0xff]  ;;  %1716 = vmatpush1.bf16.msra.mxu1 %v1715_v10 }
  0x99   :  { %v299_v8 = vld [vmem:[#allocation5 + $0x588] sm:$0xff]  ;;  %v1717_v12 = vpack.c.bf16 %v175_v7, %v171_v6  ;;  %v298_v15 = vld [vmem:[#allocation5 + $0x580] sm:$0xff]  ;;  %1778 = vmatprep.subr.bf16.mxu0 %v1777_v4  ;;  %v1719_v22 = vpack.c.bf16 %v174_v14, %v170_v13 }
  0x9a   :  { %v303_v9 = vld [vmem:[#allocation5 + $0x5a8] sm:$0xff]  ;;  %v302_v17 = vld [vmem:[#allocation5 + $0x5a0] sm:$0xff]  ;;  %1780 = vmatpush1.bf16.msra.mxu0 %v1779_v11 }
  0x9b   :  { %v1781_v16 = vpack.c.bf16 %v303_v9, %v299_v8  ;;  %v179_v18 = vld [vmem:[#allocation5 + $0x1c8] sm:$0xff]  ;;  %1718 = vmatprep.subr.bf16.mxu1 %v1717_v12  ;;  %v1783_v23 = vpack.c.bf16 %v302_v17, %v298_v15  ;;  %v178_v25 = vld [vmem:[#allocation5 + $0x1c0] sm:$0xff] }
  0x9c   :  { %v183_v19 = vld [vmem:[#allocation5 + $0x1e8] sm:$0xff]  ;;  %v182_v26 = vld [vmem:[#allocation5 + $0x1e0] sm:$0xff]  ;;  %1720 = vmatpush1.bf16.msra.mxu1 %v1719_v22 }
  0x9d   :  { %v307_v20 = vld [vmem:[#allocation5 + $0x5c8] sm:$0xff]  ;;  %v1721_v24 = vpack.c.bf16 %v183_v19, %v179_v18  ;;  %v306_v27 = vld [vmem:[#allocation5 + $0x5c0] sm:$0xff]  ;;  %1782 = vmatprep.subr.bf16.mxu0 %v1781_v16  ;;  %v1723_v34 = vpack.c.bf16 %v182_v26, %v178_v25  ;;  %v2731_v19 = vld [vmem:[#allocation2 + $0x18] sm:$0xff] }
  0x9e   :  { %v311_v21 = vld [vmem:[#allocation5 + $0x5e8] sm:$0xff]  ;;  %v310_v29 = vld [vmem:[#allocation5 + $0x5e0] sm:$0xff]  ;;  %1784 = vmatpush1.bf16.msra.mxu0 %v1783_v23  ;;  %791 = vmatprep.mubr.f32.mxu0 %v2731_v19 }
  0x9f   :  { %v1785_v28 = vpack.c.bf16 %v311_v21, %v307_v20  ;;  %v187_v30 = vld [vmem:[#allocation5 + $0x208] sm:$0xff]  ;;  %1722 = vmatprep.subr.bf16.mxu1 %v1721_v24  ;;  %v1787_v35 = vpack.c.bf16 %v310_v29, %v306_v27  ;;  %v186_v37 = vld [vmem:[#allocation5 + $0x200] sm:$0xff] }
  0xa0   :  { %v191_v31 = vld [vmem:[#allocation5 + $0x228] sm:$0xff]  ;;  %v190_v38 = vld [vmem:[#allocation5 + $0x220] sm:$0xff]  ;;  %1724 = vmatpush1.bf16.msra.mxu1 %v1723_v34 }
  0xa1   :  { %v315_v32 = vld [vmem:[#allocation5 + $0x608] sm:$0xff]  ;;  %v1725_v36 = vpack.c.bf16 %v191_v31, %v187_v30  ;;  %v314_v39 = vld [vmem:[#allocation5 + $0x600] sm:$0xff]  ;;  %1786 = vmatprep.subr.bf16.mxu0 %v1785_v28  ;;  %v1727_v46 = vpack.c.bf16 %v190_v38, %v186_v37 }
  0xa2   :  { %v319_v33 = vld [vmem:[#allocation5 + $0x628] sm:$0xff]  ;;  %v318_v41 = vld [vmem:[#allocation5 + $0x620] sm:$0xff]  ;;  %1788 = vmatpush1.bf16.msra.mxu0 %v1787_v35 }
  0xa3   :  { %v1789_v40 = vpack.c.bf16 %v319_v33, %v315_v32  ;;  %v195_v42 = vld [vmem:[#allocation5 + $0x248] sm:$0xff]  ;;  %1726 = vmatprep.subr.bf16.mxu1 %v1725_v36  ;;  %v1791_v47 = vpack.c.bf16 %v318_v41, %v314_v39  ;;  %v194_v49 = vld [vmem:[#allocation5 + $0x240] sm:$0xff] }
  0xa4   :  { %v199_v43 = vld [vmem:[#allocation5 + $0x268] sm:$0xff]  ;;  %v198_v50 = vld [vmem:[#allocation5 + $0x260] sm:$0xff]  ;;  %1728 = vmatpush1.bf16.msra.mxu1 %v1727_v46 }
  0xa5   :  { %v323_v44 = vld [vmem:[#allocation5 + $0x648] sm:$0xff]  ;;  %v1729_v48 = vpack.c.bf16 %v199_v43, %v195_v42  ;;  %v322_v51 = vld [vmem:[#allocation5 + $0x640] sm:$0xff]  ;;  %1790 = vmatprep.subr.bf16.mxu0 %v1789_v40  ;;  %v1731_v58 = vpack.c.bf16 %v198_v50, %v194_v49 }
  0xa6   :  { %v327_v45 = vld [vmem:[#allocation5 + $0x668] sm:$0xff]  ;;  %v326_v53 = vld [vmem:[#allocation5 + $0x660] sm:$0xff]  ;;  %1792 = vmatpush1.bf16.msra.mxu0 %v1791_v47 }
  0xa7   :  { %v1793_v52 = vpack.c.bf16 %v327_v45, %v323_v44  ;;  %v203_v54 = vld [vmem:[#allocation5 + $0x288] sm:$0xff]  ;;  %1730 = vmatprep.subr.bf16.mxu1 %v1729_v48  ;;  %v1795_v59 = vpack.c.bf16 %v326_v53, %v322_v51  ;;  %v202_v61 = vld [vmem:[#allocation5 + $0x280] sm:$0xff] }
  0xa8   :  { %v207_v55 = vld [vmem:[#allocation5 + $0x2a8] sm:$0xff]  ;;  %v206_v62 = vld [vmem:[#allocation5 + $0x2a0] sm:$0xff]  ;;  %1732 = vmatpush1.bf16.msra.mxu1 %v1731_v58 }
  0xa9   :  { %v331_v56 = vld [vmem:[#allocation5 + $0x688] sm:$0xff]  ;;  %v1733_v60 = vpack.c.bf16 %v207_v55, %v203_v54  ;;  %v330_v63 = vld [vmem:[#allocation5 + $0x680] sm:$0xff]  ;;  %1794 = vmatprep.subr.bf16.mxu0 %v1793_v52  ;;  %v1735_v6 = vpack.c.bf16 %v206_v62, %v202_v61 }
  0xaa   :  { %v335_v57 = vld [vmem:[#allocation5 + $0x6a8] sm:$0xff]  ;;  %v334_v1 = vld [vmem:[#allocation5 + $0x6a0] sm:$0xff]  ;;  %1796 = vmatpush1.bf16.msra.mxu0 %v1795_v59 }
  0xab   :  { %v1797_v0 = vpack.c.bf16 %v335_v57, %v331_v56  ;;  %v211_v2 = vld [vmem:[#allocation5 + $0x2c8] sm:$0xff]  ;;  %v210_v7 = vld [vmem:[#allocation5 + $0x2c0] sm:$0xff]  ;;  %1734 = vmatprep.subr.bf16.mxu1 %v1733_v60  ;;  %v1799_v8 = vpack.c.bf16 %v334_v1, %v330_v63  ;;  %v129_v1 = vld [vmem:[#allocation5 + $0x38] sm:$0xff] }
  0xac   :  { %v215_v3 = vld [vmem:[#allocation5 + $0x2e8] sm:$0xff]  ;;  %v214_v10 = vld [vmem:[#allocation5 + $0x2e0] sm:$0xff]  ;;  %1736 = vmatpush1.bf16.msra.mxu1 %v1735_v6 }
  0xad   :  { %v339_v4 = vld [vmem:[#allocation5 + $0x6c8] sm:$0xff]  ;;  %v1737_v9 = vpack.c.bf16 %v215_v3, %v211_v2  ;;  %v338_v11 = vld [vmem:[#allocation5 + $0x6c0] sm:$0xff]  ;;  %1798 = vmatprep.subr.bf16.mxu0 %v1797_v0  ;;  %v1739_v20 = vpack.c.bf16 %v214_v10, %v210_v7  ;;  %v125_v0 = vld [vmem:[#allocation5 + $0x18] sm:$0xff] }
  0xae   :  { %v343_v5 = vld [vmem:[#allocation5 + $0x6e8] sm:$0xff]  ;;  %v342_v12 = vld [vmem:[#allocation5 + $0x6e0] sm:$0xff]  ;;  %1800 = vmatpush1.bf16.msra.mxu0 %v1799_v8  ;;  %v1949_v6 = vpack.c.bf16 %v129_v1, %v125_v0  ;;  %v124_v8 = vld [vmem:[#allocation5 + $0x10] sm:$0xff] }
  0xaf   :  { %v1801_v13 = vpack.c.bf16 %v343_v5, %v339_v4  ;;  %v219_v14 = vld [vmem:[#allocation5 + $0x308] sm:$0xff]  ;;  %1738 = vmatprep.subr.bf16.mxu1 %v1737_v9  ;;  %v1803_v21 = vpack.c.bf16 %v342_v12, %v338_v11  ;;  %v218_v23 = vld [vmem:[#allocation5 + $0x300] sm:$0xff]  ;;  %v128_v9 = vld [vmem:[#allocation5 + $0x30] sm:$0xff] }
  0xb0   :  { %v223_v15 = vld [vmem:[#allocation5 + $0x328] sm:$0xff]  ;;  %v222_v24 = vld [vmem:[#allocation5 + $0x320] sm:$0xff]  ;;  %1740 = vmatpush1.bf16.msra.mxu1 %v1739_v20  ;;  %v133_v12 = vld [vmem:[#allocation5 + $0x58] sm:$0xff]  ;;  %v1951_v20 = vpack.c.bf16 %v128_v9, %v124_v8 }
  0xb1   :  { %v2728_v16 = vld [vmem:[#allocation2 + $0x8] sm:$0xff]  ;;  %v1741_v22 = vpack.c.bf16 %v223_v15, %v219_v14  ;;  %v346_v25 = vld [vmem:[#allocation5 + $0x700] sm:$0xff]  ;;  %1802 = vmatprep.subr.bf16.mxu0 %v1801_v13  ;;  %v1743_v32 = vpack.c.bf16 %v222_v24, %v218_v23  ;;  %v137_v13 = vld [vmem:[#allocation5 + $0x78] sm:$0xff] }
  0xb2   :  { %v347_v17 = vld [vmem:[#allocation5 + $0x708] sm:$0xff]  ;;  %720 = vmatprep.mubr.f32.mxu1 %v2728_v16  ;;  %v350_v27 = vld [vmem:[#allocation5 + $0x720] sm:$0xff]  ;;  %1804 = vmatpush1.bf16.msra.mxu0 %v1803_v21  ;;  %v132_v24 = vld [vmem:[#allocation5 + $0x50] sm:$0xff] }
  0xb3   :  { %v351_v18 = vld [vmem:[#allocation5 + $0x728] sm:$0xff]  ;;  %1742 = vmatprep.subr.bf16.mxu1 %v1741_v22  ;;  %v1807_v33 = vpack.c.bf16 %v350_v27, %v346_v25  ;;  %v226_v35 = vld [vmem:[#allocation5 + $0x340] sm:$0xff]  ;;  %v1953_v22 = vpack.c.bf16 %v137_v13, %v133_v12  ;;  %v136_v25 = vld [vmem:[#allocation5 + $0x70] sm:$0xff] }
  0xb4   :  { %v1805_v26 = vpack.c.bf16 %v351_v18, %v347_v17  ;;  %v227_v28 = vld [vmem:[#allocation5 + $0x348] sm:$0xff]  ;;  %v230_v36 = vld [vmem:[#allocation5 + $0x360] sm:$0xff]  ;;  %1744 = vmatpush1.bf16.msra.mxu1 %v1743_v32  ;;  %v116_v18 = vld [vmem:[#allocation2 + $0x10] sm:$0xff]  ;;  %v1955_v32 = vpack.c.bf16 %v136_v25, %v132_v24 }
  0xb5   :  { %v231_v29 = vld [vmem:[#allocation5 + $0x368] sm:$0xff]  ;;  %v354_v37 = vld [vmem:[#allocation5 + $0x740] sm:$0xff]  ;;  %v1747_v44 = vpack.c.bf16 %v230_v36, %v226_v35  ;;  %v140_v36 = vld [vmem:[#allocation5 + $0x90] sm:$0xff] }
  0xb6   :  { %v355_v30 = vld [vmem:[#allocation5 + $0x748] sm:$0xff]  ;;  %v1745_v34 = vpack.c.bf16 %v231_v29, %v227_v28  ;;  %1806 = vmatprep.subr.bf16.mxu0 %v1805_v26  ;;  %v358_v39 = vld [vmem:[#allocation5 + $0x760] sm:$0xff]  ;;  %v141_v28 = vld [vmem:[#allocation5 + $0x98] sm:$0xff] }
  0xb7   :  { %v359_v31 = vld [vmem:[#allocation5 + $0x768] sm:$0xff]  ;;  %1808 = vmatpush1.bf16.msra.mxu0 %v1807_v33  ;;  %v1811_v45 = vpack.c.bf16 %v358_v39, %v354_v37  ;;  %v234_v47 = vld [vmem:[#allocation5 + $0x380] sm:$0xff]  ;;  %v145_v29 = vld [vmem:[#allocation5 + $0xb8] sm:$0xff] }
  0xb8   :  { %v1809_v38 = vpack.c.bf16 %v359_v31, %v355_v30  ;;  %v235_v40 = vld [vmem:[#allocation5 + $0x388] sm:$0xff]  ;;  %1746 = vmatprep.subr.bf16.mxu1 %v1745_v34  ;;  %v238_v48 = vld [vmem:[#allocation5 + $0x3a0] sm:$0xff]  ;;  %v1957_v34 = vpack.c.bf16 %v145_v29, %v141_v28  ;;  %v144_v37 = vld [vmem:[#allocation5 + $0xb0] sm:$0xff] }
  0xb9   :  { %v239_v41 = vld [vmem:[#allocation5 + $0x3a8] sm:$0xff]  ;;  %v362_v49 = vld [vmem:[#allocation5 + $0x780] sm:$0xff]  ;;  %1748 = vmatpush1.bf16.msra.mxu1 %v1747_v44  ;;  %v1751_v56 = vpack.c.bf16 %v238_v48, %v234_v47  ;;  %v1959_v44 = vpack.c.bf16 %v144_v37, %v140_v36  ;;  %v148_v48 = vld [vmem:[#allocation5 + $0xd0] sm:$0xff] }
  0xba   :  { %v363_v42 = vld [vmem:[#allocation5 + $0x788] sm:$0xff]  ;;  %v1749_v46 = vpack.c.bf16 %v239_v41, %v235_v40  ;;  %1810 = vmatprep.subr.bf16.mxu0 %v1809_v38  ;;  %v366_v51 = vld [vmem:[#allocation5 + $0x7a0] sm:$0xff]  ;;  %v149_v40 = vld [vmem:[#allocation5 + $0xd8] sm:$0xff] }
  0xbb   :  { %v367_v43 = vld [vmem:[#allocation5 + $0x7a8] sm:$0xff]  ;;  %1812 = vmatpush1.bf16.msra.mxu0 %v1811_v45  ;;  %v1815_v57 = vpack.c.bf16 %v366_v51, %v362_v49  ;;  %v242_v59 = vld [vmem:[#allocation5 + $0x3c0] sm:$0xff]  ;;  %v153_v41 = vld [vmem:[#allocation5 + $0xf8] sm:$0xff] }
  0xbc   :  { %v1813_v50 = vpack.c.bf16 %v367_v43, %v363_v42  ;;  %v243_v52 = vld [vmem:[#allocation5 + $0x3c8] sm:$0xff]  ;;  %1750 = vmatprep.subr.bf16.mxu1 %v1749_v46  ;;  %v246_v60 = vld [vmem:[#allocation5 + $0x3e0] sm:$0xff]  ;;  %v1961_v46 = vpack.c.bf16 %v153_v41, %v149_v40  ;;  %v152_v49 = vld [vmem:[#allocation5 + $0xf0] sm:$0xff] }
  0xbd   :  { %v247_v53 = vld [vmem:[#allocation5 + $0x3e8] sm:$0xff]  ;;  %v370_v61 = vld [vmem:[#allocation5 + $0x7c0] sm:$0xff]  ;;  %1752 = vmatpush1.bf16.msra.mxu1 %v1751_v56  ;;  %v1755_v4 = vpack.c.bf16 %v246_v60, %v242_v59  ;;  %v156_v59 = vld [vmem:[#allocation5 + $0x110] sm:$0xff] }
  0xbe   :  { %v371_v54 = vld [vmem:[#allocation5 + $0x7c8] sm:$0xff]  ;;  %v1753_v58 = vpack.c.bf16 %v247_v53, %v243_v52  ;;  %1814 = vmatprep.subr.bf16.mxu0 %v1813_v50  ;;  %v374_v63 = vld [vmem:[#allocation5 + $0x7e0] sm:$0xff]  ;;  %v157_v52 = vld [vmem:[#allocation5 + $0x118] sm:$0xff] }
  0xbf   :  { %v375_v55 = vld [vmem:[#allocation5 + $0x7e8] sm:$0xff]  ;;  %1816 = vmatpush1.bf16.msra.mxu0 %v1815_v57  ;;  %v1819_v5 = vpack.c.bf16 %v374_v63, %v370_v61  ;;  %v378_v7 = vld [vmem:[#allocation5 + $0x800] sm:$0xff]  ;;  %v161_v53 = vld [vmem:[#allocation5 + $0x138] sm:$0xff] }
  0xc0   :  { %v1817_v62 = vpack.c.bf16 %v375_v55, %v371_v54  ;;  %v379_v2 = vld [vmem:[#allocation5 + $0x808] sm:$0xff]  ;;  %1754 = vmatprep.subr.bf16.mxu1 %v1753_v58  ;;  %v382_v11 = vld [vmem:[#allocation5 + $0x820] sm:$0xff]  ;;  %v1965_v57 = vpack.c.bf16 %v161_v53, %v157_v52  ;;  %v160_v60 = vld [vmem:[#allocation5 + $0x130] sm:$0xff] }
  0xc1   :  { %v383_v3 = vld [vmem:[#allocation5 + $0x828] sm:$0xff]  ;;  %1756 = vmatpush1.bf16.msra.mxu1 %v1755_v4  ;;  %v2734_v17 = vld [vmem:[#allocation2] sm:$0xff]  ;;  %v1823_v21 = vpack.c.bf16 %v382_v11, %v378_v7  ;;  %v165_v63 = vld [vmem:[#allocation5 + $0x158] sm:$0xff] }
  0xc2   :  { %1818 = vmatprep.subr.bf16.mxu0 %v1817_v62  ;;  %v1821_v10 = vpack.c.bf16 %v383_v3, %v379_v2  ;;  %v387_v14 = vld [vmem:[#allocation5 + $0x848] sm:$0xff]  ;;  %1950 = vmatprep.subr.bf16.mxu1 %v1949_v6  ;;  %v386_v23 = vld [vmem:[#allocation5 + $0x840] sm:$0xff]  ;;  %v169_v0 = vld [vmem:[#allocation5 + $0x178] sm:$0xff]  ;;  %v1967_v3 = vpack.c.bf16 %v160_v60, %v156_v59 }
  0xc3   :  { %v391_v15 = vld [vmem:[#allocation5 + $0x868] sm:$0xff]  ;;  %1820 = vmatpush1.bf16.msra.mxu0 %v1819_v5  ;;  %v390_v27 = vld [vmem:[#allocation5 + $0x860] sm:$0xff]  ;;  %v1969_v5 = vpack.c.bf16 %v169_v0, %v165_v63  ;;  %v164_v7 = vld [vmem:[#allocation5 + $0x150] sm:$0xff] }
  0xc4   :  { %1822 = vmatprep.subr.bf16.mxu0 %v1821_v10  ;;  %v1825_v26 = vpack.c.bf16 %v391_v15, %v387_v14  ;;  %721 = vmatmul.mubr.f32.vlgmr.msra.gmra.mrb[0].mxu1 %v2734_v17  ;;  %v395_v30 = vld [vmem:[#allocation5 + $0x888] sm:$0xff]  ;;  %v1827_v33 = vpack.c.bf16 %v390_v27, %v386_v23  ;;  %v394_v35 = vld [vmem:[#allocation5 + $0x880] sm:$0xff]  ;;  %v168_v8 = vld [vmem:[#allocation5 + $0x170] sm:$0xff] }
  0xc5   :  { %v399_v31 = vld [vmem:[#allocation5 + $0x8a8] sm:$0xff]  ;;  %1952 = vmatpush1.bf16.msra.mxu1 %v1951_v20  ;;  %v398_v39 = vld [vmem:[#allocation5 + $0x8a0] sm:$0xff]  ;;  %1004 = vmatprep.mubr.f32.mxu1 %v2728_v16  ;;  %v1963_v16 = vpack.c.bf16 %v152_v49, %v148_v48  ;;  %v173_v11 = vld [vmem:[#allocation5 + $0x198] sm:$0xff]  ;;  %v1971_v15 = vpack.c.bf16 %v168_v8, %v164_v7 }
  0xc6   :  { %792 = vmatmul.mubr.f32.vlgmr.msra.gmra.mrb[0].mxu0 %v116_v18  ;;  %1954 = vmatprep.subr.bf16.mxu1 %v1953_v22  ;;  %v1829_v38 = vpack.c.bf16 %v399_v31, %v395_v30  ;;  %v403_v42 = vld [vmem:[#allocation5 + $0x8c8] sm:$0xff]  ;;  %v1831_v45 = vpack.c.bf16 %v398_v39, %v394_v35  ;;  %v402_v47 = vld [vmem:[#allocation5 + $0x8c0] sm:$0xff]  ;;  %v177_v12 = vld [vmem:[#allocation5 + $0x1b8] sm:$0xff] }
  0xc7   :  { %1824 = vmatpush1.bf16.msra.mxu0 %v1823_v21  ;;  %v407_v43 = vld [vmem:[#allocation5 + $0x8e8] sm:$0xff]  ;;  %v406_v51 = vld [vmem:[#allocation5 + $0x8e0] sm:$0xff]  ;;  %v1973_v21 = vpack.c.bf16 %v177_v12, %v173_v11  ;;  %v172_v23 = vld [vmem:[#allocation5 + $0x190] sm:$0xff] }
  0xc8   :  { %1826 = vmatprep.subr.bf16.mxu0 %v1825_v26  ;;  %v1833_v50 = vpack.c.bf16 %v407_v43, %v403_v42  ;;  %v411_v54 = vld [vmem:[#allocation5 + $0x908] sm:$0xff]  ;;  %v1835_v56 = vpack.c.bf16 %v406_v51, %v402_v47  ;;  %v410_v58 = vld [vmem:[#allocation5 + $0x900] sm:$0xff]  ;;  %v176_v24 = vld [vmem:[#allocation5 + $0x1b0] sm:$0xff] }
  0xc9   :  { %1956 = vmatpush1.bf16.msra.mxu1 %v1955_v32  ;;  %v415_v55 = vld [vmem:[#allocation5 + $0x928] sm:$0xff]  ;;  %v414_v62 = vld [vmem:[#allocation5 + $0x920] sm:$0xff]  ;;  %v181_v26 = vld [vmem:[#allocation5 + $0x1d8] sm:$0xff]  ;;  %v1975_v31 = vpack.c.bf16 %v176_v24, %v172_v23 }
  0xca   :  { %1958 = vmatprep.subr.bf16.mxu1 %v1957_v34  ;;  %v1837_v61 = vpack.c.bf16 %v415_v55, %v411_v54  ;;  %v419_v1 = vld [vmem:[#allocation5 + $0x948] sm:$0xff]  ;;  %v1839_v4 = vpack.c.bf16 %v414_v62, %v410_v58  ;;  %v418_v6 = vld [vmem:[#allocation5 + $0x940] sm:$0xff]  ;;  %v185_v27 = vld [vmem:[#allocation5 + $0x1f8] sm:$0xff] }
  0xcb   :  { %1828 = vmatpush1.bf16.msra.mxu0 %v1827_v33  ;;  %v423_v2 = vld [vmem:[#allocation5 + $0x968] sm:$0xff]  ;;  %v422_v10 = vld [vmem:[#allocation5 + $0x960] sm:$0xff]  ;;  %v1977_v33 = vpack.c.bf16 %v185_v27, %v181_v26  ;;  %v180_v35 = vld [vmem:[#allocation5 + $0x1d0] sm:$0xff] }
  0xcc   :  { %1830 = vmatprep.subr.bf16.mxu0 %v1829_v38  ;;  %v1841_v9 = vpack.c.bf16 %v423_v2, %v419_v1  ;;  %v427_v13 = vld [vmem:[#allocation5 + $0x988] sm:$0xff]  ;;  %v426_v18 = vld [vmem:[#allocation5 + $0x980] sm:$0xff]  ;;  %v1843_v20 = vpack.c.bf16 %v422_v10, %v418_v6  ;;  %v184_v36 = vld [vmem:[#allocation5 + $0x1f0] sm:$0xff] }
  0xcd   :  { %1960 = vmatpush1.bf16.msra.mxu1 %v1959_v44  ;;  %v431_v14 = vld [vmem:[#allocation5 + $0x9a8] sm:$0xff]  ;;  %v430_v22 = vld [vmem:[#allocation5 + $0x9a0] sm:$0xff]  ;;  %v189_v39 = vld [vmem:[#allocation5 + $0x218] sm:$0xff]  ;;  %v1979_v43 = vpack.c.bf16 %v184_v36, %v180_v35 }
  0xce   :  { %1962 = vmatprep.subr.bf16.mxu1 %v1961_v46  ;;  %v1845_v25 = vpack.c.bf16 %v431_v14, %v427_v13  ;;  %v2738_v28 = vld [vmem:[#allocation2 + $0x28] sm:$0xff]  ;;  %v1847_v32 = vpack.c.bf16 %v430_v22, %v426_v18  ;;  %v434_v34 = vld [vmem:[#allocation5 + $0x9c0] sm:$0xff]  ;;  %v193_v40 = vld [vmem:[#allocation5 + $0x238] sm:$0xff] }
  0xcf   :  { %1832 = vmatpush1.bf16.msra.mxu0 %v1831_v45  ;;  %v435_v29 = vld [vmem:[#allocation5 + $0x9c8] sm:$0xff]  ;;  %862 = vmatprep.mubr.f32.mxu0 %v2738_v28  ;;  %v438_v38 = vld [vmem:[#allocation5 + $0x9e0] sm:$0xff]  ;;  %v1981_v45 = vpack.c.bf16 %v193_v40, %v189_v39  ;;  %v188_v47 = vld [vmem:[#allocation5 + $0x210] sm:$0xff] }
  0xd0   :  { %1834 = vmatprep.subr.bf16.mxu0 %v1833_v50  ;;  %v439_v30 = vld [vmem:[#allocation5 + $0x9e8] sm:$0xff]  ;;  %v1851_v44 = vpack.c.bf16 %v438_v38, %v434_v34  ;;  %v442_v46 = vld [vmem:[#allocation5 + $0xa00] sm:$0xff]  ;;  %v192_v48 = vld [vmem:[#allocation5 + $0x230] sm:$0xff] }
  0xd1   :  { %1964 = vmatpush1.bf16.msra.mxu1 %v1963_v16  ;;  %v1849_v37 = vpack.c.bf16 %v439_v30, %v435_v29  ;;  %v443_v41 = vld [vmem:[#allocation5 + $0xa08] sm:$0xff]  ;;  %v446_v50 = vld [vmem:[#allocation5 + $0xa20] sm:$0xff]  ;;  %v197_v51 = vld [vmem:[#allocation5 + $0x258] sm:$0xff]  ;;  %v1983_v55 = vpack.c.bf16 %v192_v48, %v188_v47 }
  0xd2   :  { %1966 = vmatprep.subr.bf16.mxu1 %v1965_v57  ;;  %v447_v42 = vld [vmem:[#allocation5 + $0xa28] sm:$0xff]  ;;  %v201_v52 = vld [vmem:[#allocation5 + $0x278] sm:$0xff]  ;;  %v1855_v16 = vpack.c.bf16 %v446_v50, %v442_v46  ;;  %v450_v57 = vld [vmem:[#allocation5 + $0xa40] sm:$0xff] }
  0xd3   :  { %1836 = vmatpush1.bf16.msra.mxu0 %v1835_v56  ;;  %v1853_v49 = vpack.c.bf16 %v447_v42, %v443_v41  ;;  %v451_v53 = vld [vmem:[#allocation5 + $0xa48] sm:$0xff]  ;;  %v1985_v56 = vpack.c.bf16 %v201_v52, %v197_v51  ;;  %v196_v58 = vld [vmem:[#allocation5 + $0x250] sm:$0xff]  ;;  %v205_v62 = vld [vmem:[#allocation5 + $0x298] sm:$0xff] }
  0xd4   :  { %1838 = vmatprep.subr.bf16.mxu0 %v1837_v61  ;;  %v455_v54 = vld [vmem:[#allocation5 + $0xa68] sm:$0xff]  ;;  %v200_v59 = vld [vmem:[#allocation5 + $0x270] sm:$0xff]  ;;  %v454_v61 = vld [vmem:[#allocation5 + $0xa60] sm:$0xff] }
  0xd5   :  { %1968 = vmatpush1.bf16.msra.mxu1 %v1967_v3  ;;  %v1857_v60 = vpack.c.bf16 %v455_v54, %v451_v53  ;;  %v209_v63 = vld [vmem:[#allocation5 + $0x2b8] sm:$0xff]  ;;  %v459_v0 = vld [vmem:[#allocation5 + $0xa88] sm:$0xff]  ;;  %v1987_v2 = vpack.c.bf16 %v200_v59, %v196_v58  ;;  %v1859_v3 = vpack.c.bf16 %v454_v61, %v450_v57  ;;  %v204_v6 = vld [vmem:[#allocation5 + $0x290] sm:$0xff] }
  0xd6   :  { %1970 = vmatprep.subr.bf16.mxu1 %v1969_v5  ;;  %v463_v1 = vld [vmem:[#allocation5 + $0xaa8] sm:$0xff]  ;;  %v458_v5 = vld [vmem:[#allocation5 + $0xa80] sm:$0xff]  ;;  %v208_v7 = vld [vmem:[#allocation5 + $0x2b0] sm:$0xff] }
  0xd7   :  { %1840 = vmatpush1.bf16.msra.mxu0 %v1839_v4  ;;  %v1989_v4 = vpack.c.bf16 %v209_v63, %v205_v62  ;;  %v1861_v8 = vpack.c.bf16 %v463_v1, %v459_v0  ;;  %v213_v10 = vld [vmem:[#allocation5 + $0x2d8] sm:$0xff]  ;;  %v467_v12 = vld [vmem:[#allocation5 + $0xac8] sm:$0xff]  ;;  %v1991_v14 = vpack.c.bf16 %v208_v7, %v204_v6  ;;  %v216_v22 = vld [vmem:[#allocation5 + $0x2f0] sm:$0xff] }
  0xd8   :  { %1842 = vmatprep.subr.bf16.mxu0 %v1841_v9  ;;  %v462_v9 = vld [vmem:[#allocation5 + $0xaa0] sm:$0xff]  ;;  %v217_v11 = vld [vmem:[#allocation5 + $0x2f8] sm:$0xff]  ;;  %v471_v13 = vld [vmem:[#allocation5 + $0xae8] sm:$0xff] }
  0xd9   :  { %1972 = vmatpush1.bf16.msra.mxu1 %v1971_v15  ;;  %v1863_v15 = vpack.c.bf16 %v462_v9, %v458_v5  ;;  %v1993_v18 = vpack.c.bf16 %v217_v11, %v213_v10  ;;  %v1865_v23 = vpack.c.bf16 %v471_v13, %v467_v12  ;;  %v470_v24 = vld [vmem:[#allocation5 + $0xae0] sm:$0xff]  ;;  %v225_v26 = vld [vmem:[#allocation5 + $0x338] sm:$0xff]  ;;  %v475_v27 = vld [vmem:[#allocation5 + $0xb08] sm:$0xff] }
  0xda   :  { %1974 = vmatprep.subr.bf16.mxu1 %v1973_v21  ;;  %v212_v21 = vld [vmem:[#allocation5 + $0x2d0] sm:$0xff]  ;;  %v479_v29 = vld [vmem:[#allocation5 + $0xb28] sm:$0xff]  ;;  %v229_v38 = vld [vmem:[#allocation5 + $0x358] sm:$0xff] }
  0xdb   :  { %1844 = vmatpush1.bf16.msra.mxu0 %v1843_v20  ;;  %v466_v20 = vld [vmem:[#allocation5 + $0xac0] sm:$0xff]  ;;  %v1995_v30 = vpack.c.bf16 %v216_v22, %v212_v21  ;;  %v220_v34 = vld [vmem:[#allocation5 + $0x310] sm:$0xff]  ;;  %v1869_v36 = vpack.c.bf16 %v479_v29, %v475_v27  ;;  %v233_v39 = vld [vmem:[#allocation5 + $0x378] sm:$0xff] }
  0xdc   :  { %1846 = vmatprep.subr.bf16.mxu0 %v1845_v25  ;;  %v221_v25 = vld [vmem:[#allocation5 + $0x318] sm:$0xff]  ;;  %v224_v35 = vld [vmem:[#allocation5 + $0x330] sm:$0xff]  ;;  %v483_v40 = vld [vmem:[#allocation5 + $0xb48] sm:$0xff] }
  0xdd   :  { %1976 = vmatpush1.bf16.msra.mxu1 %v1975_v31  ;;  %v1867_v31 = vpack.c.bf16 %v470_v24, %v466_v20  ;;  %v487_v41 = vld [vmem:[#allocation5 + $0xb68] sm:$0xff]  ;;  %v1999_v42 = vpack.c.bf16 %v224_v35, %v220_v34  ;;  %v228_v46 = vld [vmem:[#allocation5 + $0x350] sm:$0xff]  ;;  %v237_v50 = vld [vmem:[#allocation5 + $0x398] sm:$0xff] }
  0xde   :  { %1978 = vmatprep.subr.bf16.mxu1 %v1977_v33  ;;  %v474_v33 = vld [vmem:[#allocation5 + $0xb00] sm:$0xff]  ;;  %v232_v47 = vld [vmem:[#allocation5 + $0x370] sm:$0xff]  ;;  %v1873_v48 = vpack.c.bf16 %v487_v41, %v483_v40  ;;  %v241_v51 = vld [vmem:[#allocation5 + $0x3b8] sm:$0xff] }
  0xdf   :  { %1848 = vmatpush1.bf16.msra.mxu0 %v1847_v32  ;;  %v1997_v32 = vpack.c.bf16 %v225_v26, %v221_v25  ;;  %v491_v52 = vld [vmem:[#allocation5 + $0xb88] sm:$0xff]  ;;  %v2003_v54 = vpack.c.bf16 %v232_v47, %v228_v46  ;;  %v236_v57 = vld [vmem:[#allocation5 + $0x390] sm:$0xff]  ;;  %v245_v61 = vld [vmem:[#allocation5 + $0x3d8] sm:$0xff] }
  0xe0   :  { %1850 = vmatprep.subr.bf16.mxu0 %v1849_v37  ;;  %v478_v37 = vld [vmem:[#allocation5 + $0xb20] sm:$0xff]  ;;  %v495_v53 = vld [vmem:[#allocation5 + $0xba8] sm:$0xff]  ;;  %v240_v58 = vld [vmem:[#allocation5 + $0x3b0] sm:$0xff] }
  0xe1   :  { %1980 = vmatpush1.bf16.msra.mxu1 %v1979_v43  ;;  %v1871_v43 = vpack.c.bf16 %v478_v37, %v474_v33  ;;  %v1877_v59 = vpack.c.bf16 %v495_v53, %v491_v52  ;;  %v249_v62 = vld [vmem:[#allocation5 + $0x3f8] sm:$0xff]  ;;  %v499_v63 = vld [vmem:[#allocation5 + $0xbc8] sm:$0xff]  ;;  %v2007_v1 = vpack.c.bf16 %v240_v58, %v236_v57  ;;  %v244_v5 = vld [vmem:[#allocation5 + $0x3d0] sm:$0xff] }
  0xe2   :  { %1982 = vmatprep.subr.bf16.mxu1 %v1981_v45  ;;  %v482_v45 = vld [vmem:[#allocation5 + $0xb40] sm:$0xff]  ;;  %v503_v0 = vld [vmem:[#allocation5 + $0xbe8] sm:$0xff]  ;;  %v248_v6 = vld [vmem:[#allocation5 + $0x3f0] sm:$0xff] }
  0xe3   :  { %1852 = vmatpush1.bf16.msra.mxu0 %v1851_v44  ;;  %v2001_v44 = vpack.c.bf16 %v233_v39, %v229_v38  ;;  %v1881_v7 = vpack.c.bf16 %v503_v0, %v499_v63  ;;  %v253_v9 = vld [vmem:[#allocation5 + $0x418] sm:$0xff]  ;;  %v507_v11 = vld [vmem:[#allocation5 + $0xc08] sm:$0xff]  ;;  %v2011_v13 = vpack.c.bf16 %v248_v6, %v244_v5  ;;  %v252_v20 = vld [vmem:[#allocation5 + $0x410] sm:$0xff] }
  0xe4   :  { %1854 = vmatprep.subr.bf16.mxu0 %v1853_v49  ;;  %v486_v49 = vld [vmem:[#allocation5 + $0xb60] sm:$0xff]  ;;  %v257_v10 = vld [vmem:[#allocation5 + $0x438] sm:$0xff]  ;;  %v511_v12 = vld [vmem:[#allocation5 + $0xc28] sm:$0xff] }
  0xe5   :  { %1984 = vmatpush1.bf16.msra.mxu1 %v1983_v55  ;;  %v1875_v55 = vpack.c.bf16 %v486_v49, %v482_v45  ;;  %v256_v21 = vld [vmem:[#allocation5 + $0x430] sm:$0xff]  ;;  %v1885_v22 = vpack.c.bf16 %v511_v12, %v507_v11  ;;  %v261_v24 = vld [vmem:[#allocation5 + $0x458] sm:$0xff]  ;;  %v515_v26 = vld [vmem:[#allocation5 + $0xc48] sm:$0xff] }
  0xe6   :  { %1986 = vmatprep.subr.bf16.mxu1 %v1985_v56  ;;  %v490_v56 = vld [vmem:[#allocation5 + $0xb80] sm:$0xff]  ;;  %v265_v25 = vld [vmem:[#allocation5 + $0x478] sm:$0xff]  ;;  %v519_v27 = vld [vmem:[#allocation5 + $0xc68] sm:$0xff] }
  0xe7   :  { %1856 = vmatpush1.bf16.msra.mxu0 %v1855_v16  ;;  %v2005_v16 = vpack.c.bf16 %v241_v51, %v237_v50  ;;  %v2741_v29 = vld [vmem:[#allocation2 + $0x20] sm:$0xff]  ;;  %v260_v34 = vld [vmem:[#allocation5 + $0x450] sm:$0xff]  ;;  %v269_v38 = vld [vmem:[#allocation5 + $0x498] sm:$0xff] }
  0xe8   :  { %1858 = vmatprep.subr.bf16.mxu0 %v1857_v60  ;;  %v494_v60 = vld [vmem:[#allocation5 + $0xba0] sm:$0xff]  ;;  %v264_v35 = vld [vmem:[#allocation5 + $0x470] sm:$0xff]  ;;  %v273_v39 = vld [vmem:[#allocation5 + $0x4b8] sm:$0xff] }
  0xe9   :  { %1988 = vmatpush1.bf16.msra.mxu1 %v1987_v2  ;;  %v1879_v2 = vpack.c.bf16 %v494_v60, %v490_v56  ;;  %v514_v33 = vld [vmem:[#allocation5 + $0xc40] sm:$0xff]  ;;  %v523_v40 = vld [vmem:[#allocation5 + $0xc88] sm:$0xff]  ;;  %v2021_v45 = vpack.c.bf16 %v273_v39, %v269_v38  ;;  %v268_v47 = vld [vmem:[#allocation5 + $0x490] sm:$0xff] }
  0xea   :  { %1990 = vmatprep.subr.bf16.mxu1 %v1989_v4  ;;  %v498_v4 = vld [vmem:[#allocation5 + $0xbc0] sm:$0xff]  ;;  %v527_v41 = vld [vmem:[#allocation5 + $0xca8] sm:$0xff]  ;;  %v277_v51 = vld [vmem:[#allocation5 + $0x4d8] sm:$0xff] }
  0xeb   :  { %1860 = vmatpush1.bf16.msra.mxu0 %v1859_v3  ;;  %v2009_v3 = vpack.c.bf16 %v249_v62, %v245_v61  ;;  %v518_v37 = vld [vmem:[#allocation5 + $0xc60] sm:$0xff]  ;;  %v1893_v49 = vpack.c.bf16 %v527_v41, %v523_v40  ;;  %v531_v52 = vld [vmem:[#allocation5 + $0xcc8] sm:$0xff]  ;;  %v276_v57 = vld [vmem:[#allocation5 + $0x4d0] sm:$0xff] }
  0xec   :  { %1862 = vmatprep.subr.bf16.mxu0 %v1861_v8  ;;  %v502_v8 = vld [vmem:[#allocation5 + $0xbe0] sm:$0xff]  ;;  %v535_v53 = vld [vmem:[#allocation5 + $0xce8] sm:$0xff]  ;;  %v280_v58 = vld [vmem:[#allocation5 + $0x4f0] sm:$0xff] }
  0xed   :  { %1992 = vmatpush1.bf16.msra.mxu1 %v1991_v14  ;;  %v1883_v14 = vpack.c.bf16 %v502_v8, %v498_v4  ;;  %v522_v46 = vld [vmem:[#allocation5 + $0xc80] sm:$0xff]  ;;  %v285_v61 = vld [vmem:[#allocation5 + $0x518] sm:$0xff]  ;;  %v539_v63 = vld [vmem:[#allocation5 + $0xd08] sm:$0xff] }
  0xee   :  { %1994 = vmatprep.subr.bf16.mxu1 %v1993_v18  ;;  %v506_v18 = vld [vmem:[#allocation5 + $0xc00] sm:$0xff]  ;;  %v289_v62 = vld [vmem:[#allocation5 + $0x538] sm:$0xff]  ;;  %v543_v0 = vld [vmem:[#allocation5 + $0xd28] sm:$0xff] }
  0xef   :  { %1864 = vmatpush1.bf16.msra.mxu0 %v1863_v15  ;;  %v2013_v15 = vpack.c.bf16 %v257_v10, %v253_v9  ;;  %v526_v50 = vld [vmem:[#allocation5 + $0xca0] sm:$0xff]  ;;  %v284_v4 = vld [vmem:[#allocation5 + $0x510] sm:$0xff]  ;;  %v1901_v6 = vpack.c.bf16 %v543_v0, %v539_v63  ;;  %v293_v8 = vld [vmem:[#allocation5 + $0x558] sm:$0xff] }
  0xf0   :  { %1866 = vmatprep.subr.bf16.mxu0 %v1865_v23  ;;  %v510_v23 = vld [vmem:[#allocation5 + $0xc20] sm:$0xff]  ;;  %v288_v5 = vld [vmem:[#allocation5 + $0x530] sm:$0xff]  ;;  %v297_v9 = vld [vmem:[#allocation5 + $0x578] sm:$0xff] }
  0xf1   :  { %1996 = vmatpush1.bf16.msra.mxu1 %v1995_v30  ;;  %v2015_v30 = vpack.c.bf16 %v256_v21, %v252_v20  ;;  %v530_v56 = vld [vmem:[#allocation5 + $0xcc0] sm:$0xff]  ;;  %v547_v10 = vld [vmem:[#allocation5 + $0xd48] sm:$0xff]  ;;  %v2031_v12 = vpack.c.bf16 %v288_v5, %v284_v4  ;;  %v296_v20 = vld [vmem:[#allocation5 + $0x570] sm:$0xff] }
  0xf2   :  { %1998 = vmatprep.subr.bf16.mxu1 %v1997_v32  ;;  %v2017_v32 = vpack.c.bf16 %v265_v25, %v261_v24  ;;  %v534_v60 = vld [vmem:[#allocation5 + $0xce0] sm:$0xff]  ;;  %v551_v11 = vld [vmem:[#allocation5 + $0xd68] sm:$0xff]  ;;  %v305_v24 = vld [vmem:[#allocation5 + $0x5b8] sm:$0xff] }
  0xf3   :  { %1868 = vmatpush1.bf16.msra.mxu0 %v1867_v31  ;;  %v1887_v31 = vpack.c.bf16 %v510_v23, %v506_v18  ;;  %v292_v18 = vld [vmem:[#allocation5 + $0x550] sm:$0xff]  ;;  %v1905_v21 = vpack.c.bf16 %v551_v11, %v547_v10  ;;  %v301_v23 = vld [vmem:[#allocation5 + $0x598] sm:$0xff]  ;;  %v555_v25 = vld [vmem:[#allocation5 + $0xd88] sm:$0xff] }
  0xf4   :  { %1870 = vmatprep.subr.bf16.mxu0 %v1869_v36  ;;  %v1889_v36 = vpack.c.bf16 %v519_v27, %v515_v26  ;;  %v559_v26 = vld [vmem:[#allocation5 + $0xda8] sm:$0xff]  ;;  %v2035_v27 = vpack.c.bf16 %v296_v20, %v292_v18  ;;  %v313_v38 = vld [vmem:[#allocation5 + $0x5f8] sm:$0xff]  ;;  %v328_v4 = vld [vmem:[#allocation5 + $0x670] sm:$0xff] }
  0xf5   :  { %2000 = vmatpush1.bf16.msra.mxu1 %v1999_v42  ;;  %v2744_v42 = vld [vmem:[#allocation2 + $0x38] sm:$0xff]  ;;  %v563_v39 = vld [vmem:[#allocation5 + $0xdc8] sm:$0xff]  ;;  %v336_v18 = vld [vmem:[#allocation5 + $0x6b0] sm:$0xff] }
  0xf6   :  { %2002 = vmatprep.subr.bf16.mxu1 %v2001_v44  ;;  %v1891_v44 = vpack.c.bf16 %v518_v37, %v514_v33  ;;  %v300_v33 = vld [vmem:[#allocation5 + $0x590] sm:$0xff]  ;;  %v309_v37 = vld [vmem:[#allocation5 + $0x5d8] sm:$0xff]  ;;  %v567_v40 = vld [vmem:[#allocation5 + $0xde8] sm:$0xff] }
  0xf7   :  { %1872 = vmatpush1.bf16.msra.mxu0 %v1871_v43  ;;  %v2019_v43 = vpack.c.bf16 %v264_v35, %v260_v34  ;;  %v304_v34 = vld [vmem:[#allocation5 + $0x5b0] sm:$0xff]  ;;  %v1909_v35 = vpack.c.bf16 %v559_v26, %v555_v25  ;;  %v583_v63 = vld [vmem:[#allocation5 + $0xe68] sm:$0xff] }
  0xf8   :  { %1874 = vmatprep.subr.bf16.mxu0 %v1873_v48  ;;  %v272_v48 = vld [vmem:[#allocation5 + $0x4b0] sm:$0xff]  ;;  %v2039_v41 = vpack.c.bf16 %v304_v34, %v300_v33  ;;  %v591_v10 = vld [vmem:[#allocation5 + $0xea8] sm:$0xff] }
  0xf9   :  { %2004 = vmatpush1.bf16.msra.mxu1 %v2003_v54  ;;  %v2023_v54 = vpack.c.bf16 %v272_v48, %v268_v47  ;;  %v312_v47 = vld [vmem:[#allocation5 + $0x5f0] sm:$0xff]  ;;  %v1913_v48 = vpack.c.bf16 %v567_v40, %v563_v39  ;;  %v599_v25 = vld [vmem:[#allocation5 + $0xee8] sm:$0xff] }
  0xfa   :  { %2006 = vmatprep.subr.bf16.mxu1 %v2005_v16  ;;  %v344_v33 = vld [vmem:[#allocation5 + $0x6f0] sm:$0xff]  ;;  %v607_v39 = vld [vmem:[#allocation5 + $0xf28] sm:$0xff] }
  0xfb   :  { %1876 = vmatpush1.bf16.msra.mxu0 %v1875_v55  ;;  %v1895_v55 = vpack.c.bf16 %v526_v50, %v522_v46  ;;  %v308_v46 = vld [vmem:[#allocation5 + $0x5d0] sm:$0xff]  ;;  %v317_v50 = vld [vmem:[#allocation5 + $0x618] sm:$0xff] }
  0xfc   :  { %1878 = vmatprep.subr.bf16.mxu0 %v1877_v59  ;;  %v1897_v59 = vpack.c.bf16 %v535_v53, %v531_v52  ;;  %v575_v52 = vld [vmem:[#allocation5 + $0xe28] sm:$0xff]  ;;  %v2043_v53 = vpack.c.bf16 %v312_v47, %v308_v46  ;;  %v352_v46 = vld [vmem:[#allocation5 + $0x730] sm:$0xff] }
  0xfd   :  { %2008 = vmatpush1.bf16.msra.mxu1 %v2007_v1  ;;  %v2027_v1 = vpack.c.bf16 %v280_v58, %v276_v57  ;;  %v320_v57 = vld [vmem:[#allocation5 + $0x630] sm:$0xff] }
  0xfe   :  { %2010 = vmatprep.subr.bf16.mxu1 %v2009_v3  ;;  %v538_v3 = vld [vmem:[#allocation5 + $0xd00] sm:$0xff] }
  0xff   :  { %1880 = vmatpush1.bf16.msra.mxu0 %v1879_v2  ;;  %v2029_v2 = vpack.c.bf16 %v289_v62, %v285_v61  ;;  %v329_v61 = vld [vmem:[#allocation5 + $0x678] sm:$0xff]  ;;  %v579_v62 = vld [vmem:[#allocation5 + $0xe48] sm:$0xff] }
 0x100   :  { %1882 = vmatprep.subr.bf16.mxu0 %v1881_v7  ;;  %v542_v7 = vld [vmem:[#allocation5 + $0xd20] sm:$0xff]  ;;  %v1921_v5 = vpack.c.bf16 %v583_v63, %v579_v62  ;;  %v623_v62 = vld [vmem:[#allocation5 + $0xfa8] sm:$0xff] }
 0x101   :  { %2012 = vmatpush1.bf16.msra.mxu1 %v2011_v13  ;;  %v1903_v13 = vpack.c.bf16 %v542_v7, %v538_v3  ;;  %v324_v3 = vld [vmem:[#allocation5 + $0x650] sm:$0xff]  ;;  %v333_v7 = vld [vmem:[#allocation5 + $0x698] sm:$0xff] }
 0x102   :  { %2014 = vmatprep.subr.bf16.mxu1 %v2013_v15  ;;  %v546_v15 = vld [vmem:[#allocation5 + $0xd40] sm:$0xff]  ;;  %v2051_v11 = vpack.c.bf16 %v328_v4, %v324_v3  ;;  %v368_v3 = vld [vmem:[#allocation5 + $0x7b0] sm:$0xff] }
 0x103   :  { %1884 = vmatpush1.bf16.msra.mxu0 %v1883_v14  ;;  %v2033_v14 = vpack.c.bf16 %v297_v9, %v293_v8  ;;  %v337_v8 = vld [vmem:[#allocation5 + $0x6b8] sm:$0xff]  ;;  %v587_v9 = vld [vmem:[#allocation5 + $0xe88] sm:$0xff] }
 0x104   :  { %1886 = vmatprep.subr.bf16.mxu0 %v1885_v22  ;;  %1005 = vmatmul.mubr.f32.vlgmr.msra.gmra.mrb[2].mxu1 %v2734_v17  ;;  %v281_v17 = vld [vmem:[#allocation5 + $0x4f8] sm:$0xff]  ;;  %v550_v22 = vld [vmem:[#allocation5 + $0xd60] sm:$0xff]  ;;  %v1925_v20 = vpack.c.bf16 %v591_v10, %v587_v9  ;;  %v631_v9 = vld [vmem:[#allocation5 + $0xfe8] sm:$0xff] }
 0x105   :  { %2016 = vmatpush1.bf16.msra.mxu1 %v2015_v30  ;;  %1075 = vmatprep.mubr.f32.mxu1 %v2731_v19  ;;  %v2025_v16 = vpack.c.bf16 %v281_v17, %v277_v51  ;;  %v1899_v19 = vpack.c.bf16 %v534_v60, %v530_v56  ;;  %v1907_v30 = vpack.c.bf16 %v550_v22, %v546_v15  ;;  %v321_v51 = vld [vmem:[#allocation5 + $0x638] sm:$0xff]  ;;  %v571_v17 = vld [vmem:[#allocation5 + $0xe08] sm:$0xff]  ;;  %v316_v56 = vld [vmem:[#allocation5 + $0x610] sm:$0xff] }
 0x106   :  { %863 = vmatmul.mubr.f32.vlgmr.msra.gmra.mrb[0].mxu0 %v2741_v29  ;;  %2018 = vmatprep.subr.bf16.mxu1 %v2017_v32  ;;  %v554_v32 = vld [vmem:[#allocation5 + $0xd80] sm:$0xff]  ;;  %v1917_v58 = vpack.c.bf16 %v575_v52, %v571_v17  ;;  %v325_v60 = vld [vmem:[#allocation5 + $0x658] sm:$0xff]  ;;  %v2047_v0 = vpack.c.bf16 %v320_v57, %v316_v56  ;;  %v332_v15 = vld [vmem:[#allocation5 + $0x690] sm:$0xff] }
 0x107   :  { %1888 = vmatpush1.bf16.msra.mxu0 %v1887_v31  ;;  %933 = vmatprep.mubr.f32.mxu0 %v2744_v42  ;;  %v2037_v31 = vpack.c.bf16 %v305_v24, %v301_v23  ;;  %v341_v22 = vld [vmem:[#allocation5 + $0x6d8] sm:$0xff]  ;;  %v595_v24 = vld [vmem:[#allocation5 + $0xec8] sm:$0xff]  ;;  %v2055_v26 = vpack.c.bf16 %v336_v18, %v332_v15  ;;  %v360_v56 = vld [vmem:[#allocation5 + $0x770] sm:$0xff] }
 0x108   :  { %1890 = vmatprep.subr.bf16.mxu0 %v1889_v36  ;;  %v558_v36 = vld [vmem:[#allocation5 + $0xda0] sm:$0xff]  ;;  %v345_v23 = vld [vmem:[#allocation5 + $0x6f8] sm:$0xff]  ;;  %v1929_v34 = vpack.c.bf16 %v599_v25, %v595_v24  ;;  %v615_v17 = vld [vmem:[#allocation5 + $0xf68] sm:$0xff] }
 0x109   :  { %2020 = vmatpush1.bf16.msra.mxu1 %v2019_v43  ;;  %v1911_v43 = vpack.c.bf16 %v558_v36, %v554_v32  ;;  %v340_v32 = vld [vmem:[#allocation5 + $0x6d0] sm:$0xff]  ;;  %v349_v36 = vld [vmem:[#allocation5 + $0x718] sm:$0xff] }
 0x10a   :  { %2022 = vmatprep.subr.bf16.mxu1 %v2021_v45  ;;  %v562_v45 = vld [vmem:[#allocation5 + $0xdc0] sm:$0xff]  ;;  %v2059_v40 = vpack.c.bf16 %v344_v33, %v340_v32  ;;  %v376_v15 = vld [vmem:[#allocation5 + $0x7f0] sm:$0xff] }
 0x10b   :  { %1892 = vmatpush1.bf16.msra.mxu0 %v1891_v44  ;;  %v2041_v44 = vpack.c.bf16 %v313_v38, %v309_v37  ;;  %v353_v37 = vld [vmem:[#allocation5 + $0x738] sm:$0xff]  ;;  %v603_v38 = vld [vmem:[#allocation5 + $0xf08] sm:$0xff]  ;;  %v2749_v33 = vld [vmem:[#allocation2 + $0x30] sm:$0xff] }
 0x10c   :  { %1894 = vmatprep.subr.bf16.mxu0 %v1893_v49  ;;  %v566_v49 = vld [vmem:[#allocation5 + $0xde0] sm:$0xff]  ;;  %v1933_v47 = vpack.c.bf16 %v607_v39, %v603_v38  ;;  %v401_v38 = vld [vmem:[#allocation5 + $0x8b8] sm:$0xff]  ;;  %v2403_v39 = vld [vmem:[#allocation2 + $0x10] sm:$0xff] }
 0x10d   :  { %2024 = vmatpush1.bf16.msra.mxu1 %v2023_v54  ;;  %v1915_v54 = vpack.c.bf16 %v566_v49, %v562_v45  ;;  %v348_v45 = vld [vmem:[#allocation5 + $0x710] sm:$0xff]  ;;  %v357_v49 = vld [vmem:[#allocation5 + $0x758] sm:$0xff] }
 0x10e   :  { %2026 = vmatprep.subr.bf16.mxu1 %v2025_v16  ;;  %v570_v16 = vld [vmem:[#allocation5 + $0xe00] sm:$0xff]  ;;  %v2063_v52 = vpack.c.bf16 %v352_v46, %v348_v45 }
 0x10f   :  { %1896 = vmatpush1.bf16.msra.mxu0 %v1895_v55  ;;  %v2045_v55 = vpack.c.bf16 %v321_v51, %v317_v50  ;;  %v361_v50 = vld [vmem:[#allocation5 + $0x778] sm:$0xff]  ;;  %v611_v51 = vld [vmem:[#allocation5 + $0xf48] sm:$0xff] }
 0x110   :  { %1898 = vmatprep.subr.bf16.mxu0 %v1897_v59  ;;  %v574_v59 = vld [vmem:[#allocation5 + $0xe20] sm:$0xff]  ;;  %v1937_v57 = vpack.c.bf16 %v615_v17, %v611_v51 }
 0x111   :  { %2028 = vmatpush1.bf16.msra.mxu1 %v2027_v1  ;;  %v1919_v1 = vpack.c.bf16 %v574_v59, %v570_v16  ;;  %v356_v16 = vld [vmem:[#allocation5 + $0x750] sm:$0xff]  ;;  %v365_v59 = vld [vmem:[#allocation5 + $0x798] sm:$0xff]  ;;  %v1236_v45 = vld [vmem:[#allocation8] sm:$0xff] }
 0x112   :  { %2030 = vmatprep.subr.bf16.mxu1 %v2029_v2  ;;  %v578_v2 = vld [vmem:[#allocation5 + $0xe40] sm:$0xff]  ;;  %v2067_v63 = vpack.c.bf16 %v360_v56, %v356_v16  ;;  %v405_v16 = vld [vmem:[#allocation5 + $0x8d8] sm:$0xff] }
 0x113   :  { %1900 = vmatpush1.bf16.msra.mxu0 %v1899_v19  ;;  %v2049_v19 = vpack.c.bf16 %v329_v61, %v325_v60  ;;  %v369_v60 = vld [vmem:[#allocation5 + $0x7b8] sm:$0xff]  ;;  %v619_v61 = vld [vmem:[#allocation5 + $0xf88] sm:$0xff] }
 0x114   :  { %1902 = vmatprep.subr.bf16.mxu0 %v1901_v6  ;;  %v582_v6 = vld [vmem:[#allocation5 + $0xe60] sm:$0xff]  ;;  %v1941_v4 = vpack.c.bf16 %v623_v62, %v619_v61  ;;  %v409_v56 = vld [vmem:[#allocation5 + $0x8f8] sm:$0xff] }
 0x115   :  { %2032 = vmatpush1.bf16.msra.mxu1 %v2031_v12  ;;  %v1923_v12 = vpack.c.bf16 %v582_v6, %v578_v2  ;;  %v364_v2 = vld [vmem:[#allocation5 + $0x790] sm:$0xff]  ;;  %v373_v6 = vld [vmem:[#allocation5 + $0x7d8] sm:$0xff]  ;;  %v1244_v62 = vld [vmem:[#allocation8 + $0x40] sm:$0xff] }
 0x116   :  { %2034 = vmatprep.subr.bf16.mxu1 %v2033_v14  ;;  %v586_v14 = vld [vmem:[#allocation5 + $0xe80] sm:$0xff]  ;;  %v2071_v10 = vpack.c.bf16 %v368_v3, %v364_v2  ;;  %v413_v2 = vld [vmem:[#allocation5 + $0x918] sm:$0xff] }
 0x117   :  { %1904 = vmatpush1.bf16.msra.mxu0 %v1903_v13  ;;  %v2053_v13 = vpack.c.bf16 %v337_v8, %v333_v7  ;;  %v377_v7 = vld [vmem:[#allocation5 + $0x7f8] sm:$0xff]  ;;  %v627_v8 = vld [vmem:[#allocation5 + $0xfc8] sm:$0xff] }
 0x118   :  { %1906 = vmatprep.subr.bf16.mxu0 %v1905_v21  ;;  %v590_v21 = vld [vmem:[#allocation5 + $0xea0] sm:$0xff]  ;;  %v1945_v18 = vpack.c.bf16 %v631_v9, %v627_v8  ;;  %v417_v3 = vld [vmem:[#allocation5 + $0x938] sm:$0xff] }
 0x119   :  { %2036 = vmatpush1.bf16.msra.mxu1 %v2035_v27  ;;  %v1927_v27 = vpack.c.bf16 %v590_v21, %v586_v14  ;;  %v372_v14 = vld [vmem:[#allocation5 + $0x7d0] sm:$0xff]  ;;  %v381_v21 = vld [vmem:[#allocation5 + $0x818] sm:$0xff]  ;;  %v1248_v8 = vld [vmem:[#allocation8 + $0x60] sm:$0xff] }
 0x11a   :  { %2038 = vmatprep.subr.bf16.mxu1 %v2037_v31  ;;  %v594_v31 = vld [vmem:[#allocation5 + $0xec0] sm:$0xff]  ;;  %v1250_v9 = vld [vmem:[#allocation8 + $0x70] sm:$0xff] }
 0x11b   :  { %1908 = vmatpush1.bf16.msra.mxu0 %v1907_v30  ;;  %v2057_v30 = vpack.c.bf16 %v345_v23, %v341_v22  ;;  %v385_v22 = vld [vmem:[#allocation5 + $0x838] sm:$0xff]  ;;  %v2075_v23 = vpack.c.bf16 %v376_v15, %v372_v14 }
 0x11c   :  { %1910 = vmatprep.subr.bf16.mxu0 %v1909_v35  ;;  %v598_v35 = vld [vmem:[#allocation5 + $0xee0] sm:$0xff]  ;;  %v2077_v25 = vpack.c.bf16 %v385_v22, %v381_v21  ;;  %v421_v14 = vld [vmem:[#allocation5 + $0x958] sm:$0xff]  ;;  %v420_v21 = vld [vmem:[#allocation5 + $0x950] sm:$0xff] }
 0x11d   :  { %2040 = vmatpush1.bf16.msra.mxu1 %v2039_v41  ;;  %v1931_v41 = vpack.c.bf16 %v598_v35, %v594_v31  ;;  %v393_v31 = vld [vmem:[#allocation5 + $0x878] sm:$0xff]  ;;  %v388_v35 = vld [vmem:[#allocation5 + $0x850] sm:$0xff] }
 0x11e   :  { %2042 = vmatprep.subr.bf16.mxu1 %v2041_v44  ;;  %v602_v44 = vld [vmem:[#allocation5 + $0xf00] sm:$0xff]  ;;  %v425_v15 = vld [vmem:[#allocation5 + $0x978] sm:$0xff] }
 0x11f   :  { %1912 = vmatpush1.bf16.msra.mxu0 %v1911_v43  ;;  %v2061_v43 = vpack.c.bf16 %v353_v37, %v349_v36  ;;  %v392_v36 = vld [vmem:[#allocation5 + $0x870] sm:$0xff]  ;;  %v397_v37 = vld [vmem:[#allocation5 + $0x898] sm:$0xff] }
 0x120   :  { %1914 = vmatprep.subr.bf16.mxu0 %v1913_v48  ;;  %v606_v48 = vld [vmem:[#allocation5 + $0xf20] sm:$0xff]  ;;  %v2083_v46 = vpack.c.bf16 %v392_v36, %v388_v35  ;;  %v2085_v51 = vpack.c.bf16 %v401_v38, %v397_v37  ;;  %v428_v36 = vld [vmem:[#allocation5 + $0x990] sm:$0xff] }
 0x121   :  { %2044 = vmatpush1.bf16.msra.mxu1 %v2043_v53  ;;  %v1935_v53 = vpack.c.bf16 %v606_v48, %v602_v44  ;;  %v1239_v44 = vld [vmem:[#allocation8 + $0x18] sm:$0xff]  ;;  %v1238_v48 = vld [vmem:[#allocation8 + $0x10] sm:$0xff]  ;;  %v1256_v38 = vld [vmem:[#allocation8 + $0xa0] sm:$0xff] }
 0x122   :  { %2046 = vmatprep.subr.bf16.mxu1 %v2045_v55  ;;  %v610_v55 = vld [vmem:[#allocation5 + $0xf40] sm:$0xff]  ;;  %v2207_v17 = vpack.c.bf16 %v1238_v48, %v1236_v45  ;;  %v437_v45 = vld [vmem:[#allocation5 + $0x9d8] sm:$0xff] }
 0x123   :  { %1916 = vmatpush1.bf16.msra.mxu0 %v1915_v54  ;;  %v2065_v54 = vpack.c.bf16 %v361_v50, %v357_v49  ;;  %v1241_v49 = vld [vmem:[#allocation8 + $0x28] sm:$0xff]  ;;  %v1243_v50 = vld [vmem:[#allocation8 + $0x38] sm:$0xff] }
 0x124   :  { %1918 = vmatprep.subr.bf16.mxu0 %v1917_v58  ;;  %v614_v58 = vld [vmem:[#allocation5 + $0xf60] sm:$0xff] }
 0x125   :  { %2048 = vmatpush1.bf16.msra.mxu1 %v2047_v0  ;;  %v1939_v0 = vpack.c.bf16 %v614_v58, %v610_v55  ;;  %v1245_v55 = vld [vmem:[#allocation8 + $0x48] sm:$0xff] }
 0x126   :  { %2050 = vmatprep.subr.bf16.mxu1 %v2049_v19  ;;  %v618_v19 = vld [vmem:[#allocation5 + $0xf80] sm:$0xff] }
 0x127   :  { %1920 = vmatpush1.bf16.msra.mxu0 %v1919_v1  ;;  %v2069_v1 = vpack.c.bf16 %v369_v60, %v365_v59  ;;  %v404_v60 = vld [vmem:[#allocation5 + $0x8d0] sm:$0xff] }
 0x128   :  { %1922 = vmatprep.subr.bf16.mxu0 %v1921_v5  ;;  %v622_v5 = vld [vmem:[#allocation5 + $0xfa0] sm:$0xff] }
 0x129   :  { %2052 = vmatpush1.bf16.msra.mxu1 %v2051_v11  ;;  %v1943_v11 = vpack.c.bf16 %v622_v5, %v618_v19  ;;  %v1251_v19 = vld [vmem:[#allocation8 + $0x78] sm:$0xff] }
 0x12a   :  { %2054 = vmatprep.subr.bf16.mxu1 %v2053_v13  ;;  %v626_v13 = vld [vmem:[#allocation5 + $0xfc0] sm:$0xff] }
 0x12b   :  { %1924 = vmatpush1.bf16.msra.mxu0 %v1923_v12  ;;  %v2073_v12 = vpack.c.bf16 %v377_v7, %v373_v6  ;;  %v412_v6 = vld [vmem:[#allocation5 + $0x910] sm:$0xff] }
 0x12c   :  { %1926 = vmatprep.subr.bf16.mxu0 %v1925_v20  ;;  %v630_v20 = vld [vmem:[#allocation5 + $0xfe0] sm:$0xff] }
 0x12d   :  { %2056 = vmatpush1.bf16.msra.mxu1 %v2055_v26  ;;  %v1947_v24 = vpack.c.bf16 %v630_v20, %v626_v13  ;;  %v380_v26 = vld [vmem:[#allocation5 + $0x810] sm:$0xff]  ;;  %v1255_v13 = vld [vmem:[#allocation8 + $0x98] sm:$0xff] }
 0x12e   :  { %2058 = vmatprep.subr.bf16.mxu1 %v2057_v30  ;;  %v389_v30 = vld [vmem:[#allocation5 + $0x858] sm:$0xff] }
 0x12f   :  { %1928 = vmatpush1.bf16.msra.mxu0 %v1927_v27  ;;  %v384_v27 = vld [vmem:[#allocation5 + $0x830] sm:$0xff] }
 0x130   :  { %1930 = vmatprep.subr.bf16.mxu0 %v1929_v34  ;;  %v2079_v32 = vpack.c.bf16 %v384_v27, %v380_v26  ;;  %v2081_v34 = vpack.c.bf16 %v393_v31, %v389_v30  ;;  %v424_v26 = vld [vmem:[#allocation5 + $0x970] sm:$0xff]  ;;  %v1259_v30 = vld [vmem:[#allocation8 + $0xb8] sm:$0xff] }
 0x131   :  { %2060 = vmatpush1.bf16.msra.mxu1 %v2059_v40  ;;  %v396_v40 = vld [vmem:[#allocation5 + $0x890] sm:$0xff]  ;;  %v429_v31 = vld [vmem:[#allocation5 + $0x998] sm:$0xff]  ;;  %v2099_v35 = vpack.c.bf16 %v424_v26, %v420_v21 }
 0x132   :  { %2062 = vmatprep.subr.bf16.mxu1 %v2061_v43  ;;  %v1237_v43 = vld [vmem:[#allocation8 + $0x8] sm:$0xff] }
 0x133   :  { %1932 = vmatpush1.bf16.msra.mxu0 %v1931_v41  ;;  %v400_v41 = vld [vmem:[#allocation5 + $0x8b0] sm:$0xff] }
 0x134   :  { %1934 = vmatprep.subr.bf16.mxu0 %v1933_v47  ;;  %v2205_v47 = vpack.c.bf16 %v1239_v44, %v1237_v43  ;;  %v2087_v59 = vpack.c.bf16 %v400_v41, %v396_v40  ;;  %v1257_v27 = vld [vmem:[#allocation8 + $0xa8] sm:$0xff]  ;;  %v1263_v44 = vld [vmem:[#allocation8 + $0xd8] sm:$0xff] }
 0x135   :  { %2064 = vmatpush1.bf16.msra.mxu1 %v2063_v52  ;;  %v2209_v52 = vpack.c.bf16 %v1243_v50, %v1241_v49  ;;  %v2225_v37 = vpack.c.bf16 %v1259_v30, %v1257_v27  ;;  %v432_v41 = vld [vmem:[#allocation5 + $0x9b0] sm:$0xff]  ;;  %v1279_v27 = vld [vmem:[#allocation8 + $0x158] sm:$0xff] }
 0x136   :  { %2066 = vmatprep.subr.bf16.mxu1 %v2065_v54  ;;  %v1242_v54 = vld [vmem:[#allocation8 + $0x30] sm:$0xff]  ;;  %v1261_v43 = vld [vmem:[#allocation8 + $0xc8] sm:$0xff]  ;;  %v2103_v48 = vpack.c.bf16 %v432_v41, %v428_v36 }
 0x137   :  { %1936 = vmatpush1.bf16.msra.mxu0 %v1935_v53  ;;  %v1240_v53 = vld [vmem:[#allocation8 + $0x20] sm:$0xff]  ;;  %v436_v49 = vld [vmem:[#allocation5 + $0x9d0] sm:$0xff]  ;;  %v2229_v50 = vpack.c.bf16 %v1263_v44, %v1261_v43  ;;  %v469_v30 = vld [vmem:[#allocation5 + $0xad8] sm:$0xff] }
 0x138   :  { %1938 = vmatprep.subr.bf16.mxu0 %v1937_v57  ;;  %v1247_v57 = vld [vmem:[#allocation8 + $0x58] sm:$0xff]  ;;  %v2211_v58 = vpack.c.bf16 %v1242_v54, %v1240_v53  ;;  %v440_v53 = vld [vmem:[#allocation5 + $0x9f0] sm:$0xff] }
 0x139   :  { %2068 = vmatpush1.bf16.msra.mxu1 %v2067_v63  ;;  %v2213_v61 = vpack.c.bf16 %v1247_v57, %v1245_v55  ;;  %v1246_v63 = vld [vmem:[#allocation8 + $0x50] sm:$0xff]  ;;  %v1265_v54 = vld [vmem:[#allocation8 + $0xe8] sm:$0xff]  ;;  %v1267_v55 = vld [vmem:[#allocation8 + $0xf8] sm:$0xff] }
 0x13a   :  { %2070 = vmatprep.subr.bf16.mxu1 %v2069_v1  ;;  %v1249_v1 = vld [vmem:[#allocation8 + $0x68] sm:$0xff]  ;;  %v1283_v43 = vld [vmem:[#allocation8 + $0x178] sm:$0xff] }
 0x13b   :  { %1940 = vmatpush1.bf16.msra.mxu0 %v1939_v0  ;;  %v408_v0 = vld [vmem:[#allocation5 + $0x8f0] sm:$0xff]  ;;  %v2217_v7 = vpack.c.bf16 %v1251_v19, %v1249_v1  ;;  %v1271_v1 = vld [vmem:[#allocation8 + $0x118] sm:$0xff] }
 0x13c   :  { %1942 = vmatprep.subr.bf16.mxu0 %v1941_v4  ;;  %v2215_v4 = vpack.c.bf16 %v1246_v63, %v1244_v62  ;;  %v2091_v5 = vpack.c.bf16 %v408_v0, %v404_v60  ;;  %v2233_v60 = vpack.c.bf16 %v1267_v55, %v1265_v54  ;;  %v1266_v62 = vld [vmem:[#allocation8 + $0xf0] sm:$0xff]  ;;  %v1269_v0 = vld [vmem:[#allocation8 + $0x108] sm:$0xff]  ;;  %v1287_v54 = vld [vmem:[#allocation8 + $0x198] sm:$0xff] }
 0x13d   :  { %2072 = vmatpush1.bf16.msra.mxu1 %v2071_v10  ;;  %v2093_v10 = vpack.c.bf16 %v417_v3, %v413_v2  ;;  %v453_v19 = vld [vmem:[#allocation5 + $0xa58] sm:$0xff]  ;;  %v1277_v26 = vld [vmem:[#allocation8 + $0x148] sm:$0xff] }
 0x13e   :  { %2074 = vmatprep.subr.bf16.mxu1 %v2073_v12  ;;  %v1253_v12 = vld [vmem:[#allocation8 + $0x88] sm:$0xff]  ;;  %v457_v2 = vld [vmem:[#allocation5 + $0xa78] sm:$0xff]  ;;  %v2245_v36 = vpack.c.bf16 %v1279_v27, %v1277_v26 }
 0x13f   :  { %1944 = vmatpush1.bf16.msra.mxu0 %v1943_v11  ;;  %v416_v11 = vld [vmem:[#allocation5 + $0x930] sm:$0xff]  ;;  %v2221_v22 = vpack.c.bf16 %v1255_v13, %v1253_v12  ;;  %v1275_v12 = vld [vmem:[#allocation8 + $0x138] sm:$0xff] }
 0x140   :  { %1946 = vmatprep.subr.bf16.mxu0 %v1945_v18  ;;  %v2219_v18 = vpack.c.bf16 %v1250_v9, %v1248_v8  ;;  %v2095_v20 = vpack.c.bf16 %v416_v11, %v412_v6  ;;  %v2237_v6 = vpack.c.bf16 %v1271_v1, %v1269_v0  ;;  %v1270_v8 = vld [vmem:[#allocation8 + $0x110] sm:$0xff]  ;;  %v2113_v9 = vpack.c.bf16 %v457_v2, %v453_v19  ;;  %v1273_v11 = vld [vmem:[#allocation8 + $0x128] sm:$0xff]  ;;  %v1291_v0 = vld [vmem:[#allocation8 + $0x1b8] sm:$0xff] }
 0x141   :  { %2076 = vmatpush1.bf16.msra.mxu1 %v2075_v23  ;;  %v1252_v23 = vld [vmem:[#allocation8 + $0x80] sm:$0xff]  ;;  %v461_v13 = vld [vmem:[#allocation5 + $0xa98] sm:$0xff]  ;;  %v2241_v21 = vpack.c.bf16 %v1275_v12, %v1273_v11  ;;  %v1281_v41 = vld [vmem:[#allocation8 + $0x168] sm:$0xff] }
 0x142   :  { %2078 = vmatprep.subr.bf16.mxu1 %v2077_v25  ;;  %v2097_v25 = vpack.c.bf16 %v425_v15, %v421_v14  ;;  %v465_v14 = vld [vmem:[#allocation5 + $0xab8] sm:$0xff] }
 0x143   :  { %1948 = vmatpush1.bf16.msra.mxu0 %v1947_v24  ;;  %v1254_v24 = vld [vmem:[#allocation8 + $0x90] sm:$0xff] }
 0x144   :  { %1076 = vmatmul.mubr.f32.vlgmr.msra.gmra.mrb[2].mxu1 %v2403_v39  ;;  %2206 = vmatprep.subr.bf16.mxu0 %v2205_v47  ;;  %v1258_v39 = vld [vmem:[#allocation8 + $0xb0] sm:$0xff] }
 0x145   :  { %2080 = vmatpush1.bf16.msra.mxu1 %v2079_v32  ;;  %1146 = vmatprep.mubr.f32.mxu1 %v2738_v28  ;;  %v2089_v28 = vpack.c.bf16 %v409_v56, %v405_v16  ;;  %v433_v32 = vld [vmem:[#allocation5 + $0x9b8] sm:$0xff]  ;;  %v2227_v47 = vpack.c.bf16 %v1258_v39, %v1256_v38 }
 0x146   :  { %934 = vmatmul.mubr.f32.vlgmr.msra.gmra.mrb[0].mxu0 %v2749_v33  ;;  %2082 = vmatprep.subr.bf16.mxu1 %v2081_v34  ;;  %v2223_v34 = vpack.c.bf16 %v1254_v24, %v1252_v23  ;;  %v2101_v40 = vpack.c.bf16 %v433_v32, %v429_v31  ;;  %v445_v16 = vld [vmem:[#allocation5 + $0xa18] sm:$0xff]  ;;  %v2117_v24 = vpack.c.bf16 %v465_v14, %v461_v13 }
 0x147   :  { %2208 = vmatpush1.bf16.msra.mxu0 %v2207_v17  ;;  %v1262_v17 = vld [vmem:[#allocation8 + $0xd0] sm:$0xff] }
 0x148   :  { %2210 = vmatprep.subr.bf16.mxu0 %v2209_v52  ;;  %v449_v56 = vld [vmem:[#allocation5 + $0xa38] sm:$0xff] }
 0x149   :  { %2084 = vmatpush1.bf16.msra.mxu1 %v2083_v46  ;;  %v441_v46 = vld [vmem:[#allocation5 + $0x9f8] sm:$0xff]  ;;  %v2109_v63 = vpack.c.bf16 %v449_v56, %v445_v16 }
 0x14a   :  { %2086 = vmatprep.subr.bf16.mxu1 %v2085_v51  ;;  %v1260_v51 = vld [vmem:[#allocation8 + $0xc0] sm:$0xff]  ;;  %v2105_v52 = vpack.c.bf16 %v441_v46, %v437_v45  ;;  %v1274_v23 = vld [vmem:[#allocation8 + $0x130] sm:$0xff] }
 0x14b   :  { %2212 = vmatpush1.bf16.msra.mxu0 %v2211_v58  ;;  %v2231_v57 = vpack.c.bf16 %v1262_v17, %v1260_v51  ;;  %v2107_v58 = vpack.c.bf16 %v440_v53, %v436_v49  ;;  %v473_v31 = vld [vmem:[#allocation5 + $0xaf8] sm:$0xff]  ;;  %v2249_v49 = vpack.c.bf16 %v1283_v43, %v1281_v41  ;;  %v1285_v53 = vld [vmem:[#allocation8 + $0x188] sm:$0xff] }
 0x14c   :  { %2214 = vmatprep.subr.bf16.mxu0 %v2213_v61  ;;  %v1264_v61 = vld [vmem:[#allocation8 + $0xe0] sm:$0xff]  ;;  %v1278_v38 = vld [vmem:[#allocation8 + $0x150] sm:$0xff]  ;;  %v2121_v39 = vpack.c.bf16 %v473_v31, %v469_v30 }
 0x14d   :  { %2088 = vmatpush1.bf16.msra.mxu1 %v2087_v59  ;;  %v444_v59 = vld [vmem:[#allocation5 + $0xa10] sm:$0xff]  ;;  %v2235_v3 = vpack.c.bf16 %v1266_v62, %v1264_v61  ;;  %v477_v44 = vld [vmem:[#allocation5 + $0xb18] sm:$0xff] }
 0x14e   :  { %2090 = vmatprep.subr.bf16.mxu1 %v2089_v28  ;;  %v448_v28 = vld [vmem:[#allocation5 + $0xa30] sm:$0xff]  ;;  %v481_v45 = vld [vmem:[#allocation5 + $0xb38] sm:$0xff] }
 0x14f   :  { %2216 = vmatpush1.bf16.msra.mxu0 %v2215_v4  ;;  %v2111_v4 = vpack.c.bf16 %v448_v28, %v444_v59  ;;  %v1282_v51 = vld [vmem:[#allocation8 + $0x170] sm:$0xff]  ;;  %v2125_v17 = vpack.c.bf16 %v481_v45, %v477_v44  ;;  %v2253_v59 = vpack.c.bf16 %v1287_v54, %v1285_v53  ;;  %v1289_v28 = vld [vmem:[#allocation8 + $0x1a8] sm:$0xff] }
 0x150   :  { %2218 = vmatprep.subr.bf16.mxu0 %v2217_v7  ;;  %v1268_v7 = vld [vmem:[#allocation8 + $0x100] sm:$0xff]  ;;  %v485_v55 = vld [vmem:[#allocation5 + $0xb58] sm:$0xff] }
 0x151   :  { %2092 = vmatpush1.bf16.msra.mxu1 %v2091_v5  ;;  %v452_v5 = vld [vmem:[#allocation5 + $0xa50] sm:$0xff]  ;;  %v2239_v15 = vpack.c.bf16 %v1270_v8, %v1268_v7  ;;  %v489_v16 = vld [vmem:[#allocation5 + $0xb78] sm:$0xff] }
 0x152   :  { %2094 = vmatprep.subr.bf16.mxu1 %v2093_v10  ;;  %v456_v10 = vld [vmem:[#allocation5 + $0xa70] sm:$0xff]  ;;  %v2129_v62 = vpack.c.bf16 %v489_v16, %v485_v55  ;;  %v493_v1 = vld [vmem:[#allocation5 + $0xb98] sm:$0xff] }
 0x153   :  { %2220 = vmatpush1.bf16.msra.mxu0 %v2219_v18  ;;  %v2115_v18 = vpack.c.bf16 %v456_v10, %v452_v5  ;;  %v1286_v61 = vld [vmem:[#allocation8 + $0x190] sm:$0xff]  ;;  %v1288_v5 = vld [vmem:[#allocation8 + $0x1a0] sm:$0xff] }
 0x154   :  { %2222 = vmatprep.subr.bf16.mxu0 %v2221_v22  ;;  %v1272_v22 = vld [vmem:[#allocation8 + $0x120] sm:$0xff]  ;;  %v497_v19 = vld [vmem:[#allocation5 + $0xbb8] sm:$0xff]  ;;  %v492_v8 = vld [vmem:[#allocation5 + $0xb90] sm:$0xff] }
 0x155   :  { %2096 = vmatpush1.bf16.msra.mxu1 %v2095_v20  ;;  %v460_v20 = vld [vmem:[#allocation5 + $0xa90] sm:$0xff]  ;;  %v2243_v32 = vpack.c.bf16 %v1274_v23, %v1272_v22  ;;  %v2133_v7 = vpack.c.bf16 %v497_v19, %v493_v1  ;;  %v501_v10 = vld [vmem:[#allocation5 + $0xbd8] sm:$0xff] }
 0x156   :  { %2098 = vmatprep.subr.bf16.mxu1 %v2097_v25  ;;  %v464_v25 = vld [vmem:[#allocation5 + $0xab0] sm:$0xff]  ;;  %v505_v11 = vld [vmem:[#allocation5 + $0xbf8] sm:$0xff] }
 0x157   :  { %2224 = vmatpush1.bf16.msra.mxu0 %v2223_v34  ;;  %v2119_v34 = vpack.c.bf16 %v464_v25, %v460_v20  ;;  %v2137_v14 = vpack.c.bf16 %v505_v11, %v501_v10  ;;  %v509_v20 = vld [vmem:[#allocation5 + $0xc18] sm:$0xff]  ;;  %v512_v25 = vld [vmem:[#allocation5 + $0xc30] sm:$0xff] }
 0x158   :  { %2226 = vmatprep.subr.bf16.mxu0 %v2225_v37  ;;  %v1276_v37 = vld [vmem:[#allocation8 + $0x140] sm:$0xff]  ;;  %v517_v26 = vld [vmem:[#allocation5 + $0xc58] sm:$0xff]  ;;  %v548_v55 = vld [vmem:[#allocation5 + $0xd50] sm:$0xff] }
 0x159   :  { %2100 = vmatpush1.bf16.msra.mxu1 %v2099_v35  ;;  %v468_v35 = vld [vmem:[#allocation5 + $0xad0] sm:$0xff]  ;;  %v2247_v46 = vpack.c.bf16 %v1278_v38, %v1276_v37  ;;  %v521_v27 = vld [vmem:[#allocation5 + $0xc78] sm:$0xff] }
 0x15a   :  { %2102 = vmatprep.subr.bf16.mxu1 %v2101_v40  ;;  %v472_v40 = vld [vmem:[#allocation5 + $0xaf0] sm:$0xff]  ;;  %v2145_v31 = vpack.c.bf16 %v521_v27, %v517_v26  ;;  %v533_v41 = vld [vmem:[#allocation5 + $0xcd8] sm:$0xff] }
 0x15b   :  { %2228 = vmatpush1.bf16.msra.mxu0 %v2227_v47  ;;  %v2123_v47 = vpack.c.bf16 %v472_v40, %v468_v35  ;;  %v525_v35 = vld [vmem:[#allocation5 + $0xc98] sm:$0xff]  ;;  %v528_v40 = vld [vmem:[#allocation5 + $0xcb0] sm:$0xff] }
 0x15c   :  { %2230 = vmatprep.subr.bf16.mxu0 %v2229_v50  ;;  %v1280_v50 = vld [vmem:[#allocation8 + $0x160] sm:$0xff]  ;;  %v537_v43 = vld [vmem:[#allocation5 + $0xcf8] sm:$0xff]  ;;  %v552_v16 = vld [vmem:[#allocation5 + $0xd70] sm:$0xff] }
 0x15d   :  { %2104 = vmatpush1.bf16.msra.mxu1 %v2103_v48  ;;  %v476_v48 = vld [vmem:[#allocation5 + $0xb10] sm:$0xff]  ;;  %v2251_v56 = vpack.c.bf16 %v1282_v51, %v1280_v50  ;;  %v2153_v45 = vpack.c.bf16 %v537_v43, %v533_v41  ;;  %v585_v26 = vld [vmem:[#allocation5 + $0xe78] sm:$0xff] }
 0x15e   :  { %2106 = vmatprep.subr.bf16.mxu1 %v2105_v52  ;;  %v480_v52 = vld [vmem:[#allocation5 + $0xb30] sm:$0xff] }
 0x15f   :  { %2232 = vmatpush1.bf16.msra.mxu0 %v2231_v57  ;;  %v2127_v57 = vpack.c.bf16 %v480_v52, %v476_v48  ;;  %v541_v48 = vld [vmem:[#allocation5 + $0xd18] sm:$0xff]  ;;  %v540_v51 = vld [vmem:[#allocation5 + $0xd10] sm:$0xff] }
 0x160   :  { %2234 = vmatprep.subr.bf16.mxu0 %v2233_v60  ;;  %v1284_v60 = vld [vmem:[#allocation8 + $0x180] sm:$0xff]  ;;  %v553_v52 = vld [vmem:[#allocation5 + $0xd78] sm:$0xff]  ;;  %v568_v11 = vld [vmem:[#allocation5 + $0xdf0] sm:$0xff] }
 0x161   :  { %2108 = vmatpush1.bf16.msra.mxu1 %v2107_v58  ;;  %v484_v58 = vld [vmem:[#allocation5 + $0xb50] sm:$0xff]  ;;  %v2255_v2 = vpack.c.bf16 %v1286_v61, %v1284_v60  ;;  %v1295_v61 = vld [vmem:[#allocation8 + $0x1d8] sm:$0xff] }
 0x162   :  { %2110 = vmatprep.subr.bf16.mxu1 %v2109_v63  ;;  %v488_v63 = vld [vmem:[#allocation5 + $0xb70] sm:$0xff] }
 0x163   :  { %2236 = vmatpush1.bf16.msra.mxu0 %v2235_v3  ;;  %v2131_v3 = vpack.c.bf16 %v488_v63, %v484_v58  ;;  %v2163_v58 = vpack.c.bf16 %v552_v16, %v548_v55  ;;  %v1293_v60 = vld [vmem:[#allocation8 + $0x1c8] sm:$0xff]  ;;  %v1294_v1 = vld [vmem:[#allocation8 + $0x1d0] sm:$0xff] }
 0x164   :  { %2238 = vmatprep.subr.bf16.mxu0 %v2237_v6  ;;  %v1290_v6 = vld [vmem:[#allocation8 + $0x1b0] sm:$0xff]  ;;  %v1301_v27 = vld [vmem:[#allocation8 + $0x208] sm:$0xff] }
 0x165   :  { %2112 = vmatpush1.bf16.msra.mxu1 %v2111_v4  ;;  %v2257_v4 = vpack.c.bf16 %v1291_v0, %v1289_v28  ;;  %v2259_v12 = vpack.c.bf16 %v1290_v6, %v1288_v5  ;;  %v560_v63 = vld [vmem:[#allocation5 + $0xdb0] sm:$0xff]  ;;  %v2261_v28 = vpack.c.bf16 %v1295_v61, %v1293_v60  ;;  %v1292_v0 = vld [vmem:[#allocation8 + $0x1c0] sm:$0xff] }
 0x166   :  { %2114 = vmatprep.subr.bf16.mxu1 %v2113_v9  ;;  %v496_v9 = vld [vmem:[#allocation5 + $0xbb0] sm:$0xff] }
 0x167   :  { %2240 = vmatpush1.bf16.msra.mxu0 %v2239_v15  ;;  %v2135_v13 = vpack.c.bf16 %v496_v9, %v492_v8  ;;  %v500_v15 = vld [vmem:[#allocation5 + $0xbd0] sm:$0xff]  ;;  %v1299_v9 = vld [vmem:[#allocation8 + $0x1f8] sm:$0xff] }
 0x168   :  { %2242 = vmatprep.subr.bf16.mxu0 %v2241_v21  ;;  %v513_v21 = vld [vmem:[#allocation5 + $0xc38] sm:$0xff]  ;;  %v1297_v8 = vld [vmem:[#allocation8 + $0x1e8] sm:$0xff] }
 0x169   :  { %2116 = vmatpush1.bf16.msra.mxu1 %v2115_v18  ;;  %v504_v18 = vld [vmem:[#allocation5 + $0xbf0] sm:$0xff]  ;;  %v2141_v23 = vpack.c.bf16 %v513_v21, %v509_v20 }
 0x16a   :  { %2118 = vmatprep.subr.bf16.mxu1 %v2117_v24  ;;  %v2139_v22 = vpack.c.bf16 %v504_v18, %v500_v15  ;;  %v508_v24 = vld [vmem:[#allocation5 + $0xc10] sm:$0xff]  ;;  %v573_v15 = vld [vmem:[#allocation5 + $0xe18] sm:$0xff] }
 0x16b   :  { %2244 = vmatpush1.bf16.msra.mxu0 %v2243_v32  ;;  %v2143_v30 = vpack.c.bf16 %v512_v25, %v508_v24  ;;  %v516_v32 = vld [vmem:[#allocation5 + $0xc50] sm:$0xff]  ;;  %v577_v18 = vld [vmem:[#allocation5 + $0xe38] sm:$0xff] }
 0x16c   :  { %2246 = vmatprep.subr.bf16.mxu0 %v2245_v36  ;;  %v529_v36 = vld [vmem:[#allocation5 + $0xcb8] sm:$0xff]  ;;  %v576_v24 = vld [vmem:[#allocation5 + $0xe30] sm:$0xff] }
 0x16d   :  { %2120 = vmatpush1.bf16.msra.mxu1 %v2119_v34  ;;  %v520_v34 = vld [vmem:[#allocation5 + $0xc70] sm:$0xff]  ;;  %v2149_v38 = vpack.c.bf16 %v529_v36, %v525_v35  ;;  %v581_v25 = vld [vmem:[#allocation5 + $0xe58] sm:$0xff] }
 0x16e   :  { %2122 = vmatprep.subr.bf16.mxu1 %v2121_v39  ;;  %v2147_v37 = vpack.c.bf16 %v520_v34, %v516_v32  ;;  %v524_v39 = vld [vmem:[#allocation5 + $0xc90] sm:$0xff]  ;;  %v2177_v34 = vpack.c.bf16 %v585_v26, %v581_v25  ;;  %v1307_v26 = vld [vmem:[#allocation8 + $0x238] sm:$0xff] }
 0x16f   :  { %2248 = vmatpush1.bf16.msra.mxu0 %v2247_v46  ;;  %v2151_v44 = vpack.c.bf16 %v528_v40, %v524_v39  ;;  %v532_v46 = vld [vmem:[#allocation5 + $0xcd0] sm:$0xff] }
 0x170   :  { %2250 = vmatprep.subr.bf16.mxu0 %v2249_v49  ;;  %v545_v49 = vld [vmem:[#allocation5 + $0xd38] sm:$0xff]  ;;  %v580_v35 = vld [vmem:[#allocation5 + $0xe50] sm:$0xff] }
 0x171   :  { %2124 = vmatpush1.bf16.msra.mxu1 %v2123_v47  ;;  %v536_v47 = vld [vmem:[#allocation5 + $0xcf0] sm:$0xff]  ;;  %v2157_v50 = vpack.c.bf16 %v545_v49, %v541_v48 }
 0x172   :  { %2126 = vmatprep.subr.bf16.mxu1 %v2125_v17  ;;  %v549_v17 = vld [vmem:[#allocation5 + $0xd58] sm:$0xff]  ;;  %v584_v36 = vld [vmem:[#allocation5 + $0xe70] sm:$0xff] }
 0x173   :  { %2252 = vmatpush1.bf16.msra.mxu0 %v2251_v56  ;;  %v2161_v54 = vpack.c.bf16 %v553_v52, %v549_v17  ;;  %v557_v56 = vld [vmem:[#allocation5 + $0xd98] sm:$0xff]  ;;  %v2179_v39 = vpack.c.bf16 %v584_v36, %v580_v35  ;;  %v588_v41 = vld [vmem:[#allocation5 + $0xe90] sm:$0xff] }
 0x174   :  { %2254 = vmatprep.subr.bf16.mxu0 %v2253_v59  ;;  %v556_v59 = vld [vmem:[#allocation5 + $0xd90] sm:$0xff]  ;;  %v1311_v36 = vld [vmem:[#allocation8 + $0x258] sm:$0xff] }
 0x175   :  { %2128 = vmatpush1.bf16.msra.mxu1 %v2127_v57  ;;  %v561_v57 = vld [vmem:[#allocation5 + $0xdb8] sm:$0xff]  ;;  %v2167_v6 = vpack.c.bf16 %v560_v63, %v556_v59  ;;  %v592_v43 = vld [vmem:[#allocation5 + $0xeb0] sm:$0xff] }
 0x176   :  { %2130 = vmatprep.subr.bf16.mxu1 %v2129_v62  ;;  %v2165_v62 = vpack.c.bf16 %v561_v57, %v557_v56  ;;  %v596_v48 = vld [vmem:[#allocation5 + $0xed0] sm:$0xff]  ;;  %v625_v59 = vld [vmem:[#allocation5 + $0xfb8] sm:$0xff] }
 0x177   :  { %2256 = vmatpush1.bf16.msra.mxu0 %v2255_v2  ;;  %v565_v2 = vld [vmem:[#allocation5 + $0xdd8] sm:$0xff]  ;;  %v600_v49 = vld [vmem:[#allocation5 + $0xef0] sm:$0xff] }
 0x178   :  { %2258 = vmatprep.subr.bf16.mxu0 %v2257_v4  ;;  %v2263_v4 = vpack.c.bf16 %v1294_v1, %v1292_v0  ;;  %v604_v17 = vld [vmem:[#allocation5 + $0xf10] sm:$0xff]  ;;  %v633_v0 = vld [vmem:[#allocation5 + $0xff8] sm:$0xff] }
 0x179   :  { %2132 = vmatpush1.bf16.msra.mxu1 %v2131_v3  ;;  %v569_v3 = vld [vmem:[#allocation5 + $0xdf8] sm:$0xff]  ;;  %v608_v52 = vld [vmem:[#allocation5 + $0xf30] sm:$0xff] }
 0x17a   :  { %2134 = vmatprep.subr.bf16.mxu1 %v2133_v7  ;;  %v564_v7 = vld [vmem:[#allocation5 + $0xdd0] sm:$0xff]  ;;  %v2169_v10 = vpack.c.bf16 %v569_v3, %v565_v2  ;;  %v2191_v55 = vpack.c.bf16 %v608_v52, %v604_v17 }
 0x17b   :  { %2260 = vmatpush1.bf16.msra.mxu0 %v2259_v12  ;;  %v2265_v12 = vpack.c.bf16 %v1299_v9, %v1297_v8  ;;  %v2171_v21 = vpack.c.bf16 %v568_v11, %v564_v7  ;;  %v612_v56 = vld [vmem:[#allocation5 + $0xf50] sm:$0xff]  ;;  %v636_v7 = vlaneseq }
 0x17c   :  { %2262 = vmatprep.subr.bf16.mxu0 %v2261_v28  ;;  %v616_v57 = vld [vmem:[#allocation5 + $0xf70] sm:$0xff]  ;;  %v629_v28 = vld [vmem:[#allocation5 + $0xfd8] sm:$0xff] }
 0x17d   :  { %2136 = vmatpush1.bf16.msra.mxu1 %v2135_v13  ;;  %v1296_v13 = vld [vmem:[#allocation8 + $0x1e0] sm:$0xff]  ;;  %v2195_v60 = vpack.c.bf16 %v616_v57, %v612_v56  ;;  %v624_v63 = vld [vmem:[#allocation5 + $0xfb0] sm:$0xff]  ;;  %v2201_v2 = vpack.c.bf16 %v633_v0, %v629_v28  ;;  %v2760_v8 = vshrl.u32 %v636_v7, 7  ;;  %v1319_v28 = vld [vmem:[#allocation8 + $0x298] sm:$0xff] }
 0x17e   :  { %2138 = vmatprep.subr.bf16.mxu1 %v2137_v14  ;;  %v1298_v14 = vld [vmem:[#allocation8 + $0x1f0] sm:$0xff]  ;;  %v1305_v25 = vld [vmem:[#allocation8 + $0x228] sm:$0xff] }
 0x17f   :  { %2264 = vmatpush1.bf16.msra.mxu0 %v2263_v4  ;;  %v2267_v20 = vpack.c.bf16 %v1298_v14, %v1296_v13  ;;  %v628_v3 = vld [vmem:[#allocation5 + $0xfd0] sm:$0xff]  ;;  %v638_v9 = vsub.s32 0, %v2760_v8  ;;  %v642_v11 = vsub.s32 1, %v2760_v8 }
 0x180   :  { %2266 = vmatprep.subr.bf16.mxu0 %v2265_v12  ;;  %v632_v4 = vld [vmem:[#allocation5 + $0xff0] sm:$0xff] }
 0x181   :  { %2140 = vmatpush1.bf16.msra.mxu1 %v2139_v22  ;;  %v2173_v22 = vpack.c.bf16 %v577_v18, %v573_v15  ;;  %v1306_v35 = vld [vmem:[#allocation8 + $0x230] sm:$0xff]  ;;  %v1313_v52 = vld [vmem:[#allocation8 + $0x268] sm:$0xff] }
 0x182   :  { %2142 = vmatprep.subr.bf16.mxu1 %v2141_v23  ;;  %v572_v23 = vld [vmem:[#allocation5 + $0xe10] sm:$0xff] }
 0x183   :  { %2268 = vmatpush1.bf16.msra.mxu0 %v2267_v20  ;;  %v1545_v17 = vld [vmem:[#allocation11 + $0xa8] sm:$0xff] }
 0x184   :  { %1147 = vmatmul.mubr.f32.vlgmr.msra.gmra.mrb[2].mxu1 %v2741_v29  ;;  %v2155_v29 = vpack.c.bf16 %v536_v47, %v532_v46  ;;  %v2183_v46 = vpack.c.bf16 %v592_v43, %v588_v41  ;;  %v1525_v41 = vld [vmem:[#allocation11 + $0x8] sm:$0xff]  ;;  %v1542_v43 = vld [vmem:[#allocation11 + $0x90] sm:$0xff] }
 0x185   :  { %2144 = vmatpush1.bf16.msra.mxu1 %v2143_v30  ;;  %1217 = vmatprep.mubr.f32.mxu1 %v2744_v42  ;;  %v544_v42 = vld [vmem:[#allocation5 + $0xd30] sm:$0xff]  ;;  %v1303_v30 = vld [vmem:[#allocation8 + $0x218] sm:$0xff] }
 0x186   :  { %2146 = vmatprep.subr.bf16.mxu1 %v2145_v31  ;;  %v2159_v53 = vpack.c.bf16 %v544_v42, %v540_v51  ;;  %v2175_v31 = vpack.c.bf16 %v576_v24, %v572_v23  ;;  %v2269_v32 = vpack.c.bf16 %v1303_v30, %v1301_v27  ;;  %v2187_v51 = vpack.c.bf16 %v600_v49, %v596_v48  ;;  %v1302_v23 = vld [vmem:[#allocation8 + $0x210] sm:$0xff]  ;;  %v1527_v49 = vld [vmem:[#allocation11 + $0x18] sm:$0xff] }
 0x187   :  { %v1526_v48 = vld [vmem:[#allocation11 + $0x10] sm:$0xff]  ;;  %v1529_v56 = vld [vmem:[#allocation11 + $0x28] sm:$0xff] }
 0x188   :  { %2270 = vmatprep.subr.bf16.mxu0 %v2269_v32  ;;  %v1549_v7 = vld [vmem:[#allocation11 + $0xc8] sm:$0xff] }
 0x189   :  { %2148 = vmatpush1.bf16.msra.mxu1 %v2147_v37  ;;  %v589_v37 = vld [vmem:[#allocation5 + $0xe98] sm:$0xff] }
 0x18a   :  { %2150 = vmatprep.subr.bf16.mxu1 %v2149_v38  ;;  %v593_v38 = vld [vmem:[#allocation5 + $0xeb8] sm:$0xff] }
 0x18b   :  { %v2181_v40 = vpack.c.bf16 %v593_v38, %v589_v37  ;;  %v1540_v37 = vld [vmem:[#allocation11 + $0x80] sm:$0xff]  ;;  %v1541_v38 = vld [vmem:[#allocation11 + $0x88] sm:$0xff] }
 0x18d   :  { %2152 = vmatpush1.bf16.msra.mxu1 %v2151_v44  ;;  %v597_v44 = vld [vmem:[#allocation5 + $0xed8] sm:$0xff] }
 0x18e   :  { %2154 = vmatprep.subr.bf16.mxu1 %v2153_v45  ;;  %v601_v45 = vld [vmem:[#allocation5 + $0xef8] sm:$0xff] }
 0x18f   :  { %v2185_v47 = vpack.c.bf16 %v601_v45, %v597_v44  ;;  %v1543_v44 = vld [vmem:[#allocation11 + $0x98] sm:$0xff] }
 0x191   :  { %2156 = vmatpush1.bf16.msra.mxu1 %v2155_v29  ;;  %v605_v29 = vld [vmem:[#allocation5 + $0xf18] sm:$0xff] }
 0x192   :  { %2158 = vmatprep.subr.bf16.mxu1 %v2157_v50  ;;  %v609_v50 = vld [vmem:[#allocation5 + $0xf38] sm:$0xff] }
 0x193   :  { %v2189_v42 = vpack.c.bf16 %v609_v50, %v605_v29  ;;  %v1544_v29 = vld [vmem:[#allocation11 + $0xa0] sm:$0xff] }
 0x195   :  { %2160 = vmatpush1.bf16.msra.mxu1 %v2159_v53  ;;  %v613_v53 = vld [vmem:[#allocation5 + $0xf58] sm:$0xff] }
 0x196   :  { %2162 = vmatprep.subr.bf16.mxu1 %v2161_v54  ;;  %v617_v54 = vld [vmem:[#allocation5 + $0xf78] sm:$0xff] }
 0x197   :  { %v2755_v19 = vpop.f32.mrb[0].mxu1  ;;  %v2193_v16 = vpack.c.bf16 %v617_v54, %v613_v53  ;;  %v1315_v53 = vld [vmem:[#allocation8 + $0x278] sm:$0xff]  ;;  %v2339_v54 = vpack.c.bf16 %v1527_v49, %v1526_v48  ;;  %v1333_v48 = vld [vmem:[#allocation8 + $0x308] sm:$0xff] }
 0x198   :  { %v2757_v5 = vpop.f32.mrb[1].mxu1  ;;  %v1335_v49 = vld [vmem:[#allocation8 + $0x318] sm:$0xff] }
 0x199   :  { %2164 = vmatpush1.bf16.msra.mxu1 %v2163_v58  ;;  %v621_v58 = vld [vmem:[#allocation5 + $0xf98] sm:$0xff] }
 0x19a   :  { %2166 = vmatprep.subr.bf16.mxu1 %v2165_v62  ;;  %v2197_v61 = vpack.c.bf16 %v625_v59, %v621_v58  ;;  %v620_v62 = vld [vmem:[#allocation5 + $0xf90] sm:$0xff]  ;;  %v1547_v59 = vld [vmem:[#allocation11 + $0xb8] sm:$0xff] }
 0x19b   :  { %v2199_v1 = vpack.c.bf16 %v624_v63, %v620_v62  ;;  %v1546_v58 = vld [vmem:[#allocation11 + $0xb0] sm:$0xff]  ;;  %v1317_v63 = vld [vmem:[#allocation8 + $0x288] sm:$0xff] }
 0x19c   :  { %v1314_v62 = vld [vmem:[#allocation8 + $0x270] sm:$0xff] }
 0x19d   :  { %2168 = vmatpush1.bf16.msra.mxu1 %v2167_v6  ;;  %v2203_v6 = vpack.c.bf16 %v632_v4, %v628_v3  ;;  %v1531_v3 = vld [vmem:[#allocation11 + $0x38] sm:$0xff] }
 0x19e   :  { %2170 = vmatprep.subr.bf16.mxu1 %v2169_v10  ;;  %v2763_v10 = vld [vmem:[#allocation7] sm:$0xf] }
 0x19f   :  { %v639_v12 = vrot.slane %v2763_v10, %v638_v9  ;;  %v643_v13 = vrot.slane %v2763_v10, %v642_v11 }
 0x1a1   :  { %2172 = vmatpush1.bf16.msra.mxu1 %v2171_v21  ;;  %v723_v14 = vadd.f32 %v2755_v19, %v639_v12  ;;  %v1309_v19 = vld [vmem:[#allocation8 + $0x248] sm:$0xff]  ;;  %v2285_v12 = vpack.c.bf16 %v1319_v28, %v1317_v63  ;;  %v1347_v63 = vld [vmem:[#allocation8 + $0x378] sm:$0xff] }
 0x1a2   :  { %2174 = vmatprep.subr.bf16.mxu1 %v2173_v22  ;;  %v1300_v22 = vld [vmem:[#allocation8 + $0x200] sm:$0xff]  ;;  %v2277_v50 = vpack.c.bf16 %v1311_v36, %v1309_v19  ;;  %v1534_v19 = vld [vmem:[#allocation11 + $0x50] sm:$0xff] }
 0x1a3   :  { %v2271_v30 = vpack.c.bf16 %v1302_v23, %v1300_v22  ;;  %v1533_v22 = vld [vmem:[#allocation11 + $0x48] sm:$0xff]  ;;  %v1535_v36 = vld [vmem:[#allocation11 + $0x58] sm:$0xff] }
 0x1a5   :  { %2176 = vmatpush1.bf16.msra.mxu1 %v2175_v31  ;;  %v1304_v31 = vld [vmem:[#allocation8 + $0x220] sm:$0xff] }
 0x1a6   :  { %2178 = vmatprep.subr.bf16.mxu1 %v2177_v34  ;;  %v2273_v34 = vpack.c.bf16 %v1307_v26, %v1305_v25  ;;  %v2275_v45 = vpack.c.bf16 %v1306_v35, %v1304_v31  ;;  %v1551_v25 = vld [vmem:[#allocation11 + $0xd8] sm:$0xff]  ;;  %v1325_v31 = vld [vmem:[#allocation8 + $0x2c8] sm:$0xff] }
 0x1a9   :  { %2180 = vmatpush1.bf16.msra.mxu1 %v2179_v39  ;;  %v1524_v39 = vld [vmem:[#allocation11] sm:$0xff] }
 0x1aa   :  { %2182 = vmatprep.subr.bf16.mxu1 %v2181_v40  ;;  %v2333_v40 = vpack.c.bf16 %v1541_v38, %v1540_v37  ;;  %v1324_v38 = vld [vmem:[#allocation8 + $0x2c0] sm:$0xff] }
 0x1ad   :  { %2184 = vmatpush1.bf16.msra.mxu1 %v2183_v46  ;;  %v2335_v46 = vpack.c.bf16 %v1525_v41, %v1524_v39  ;;  %v1326_v39 = vld [vmem:[#allocation8 + $0x2d0] sm:$0xff]  ;;  %v1331_v41 = vld [vmem:[#allocation8 + $0x2f8] sm:$0xff] }
 0x1ae   :  { %2186 = vmatprep.subr.bf16.mxu1 %v2185_v47  ;;  %v2337_v47 = vpack.c.bf16 %v1543_v44, %v1542_v43  ;;  %v2355_v43 = vpack.c.bf16 %v1535_v36, %v1534_v19  ;;  %v2295_v44 = vpack.c.bf16 %v1326_v39, %v1324_v38  ;;  %v1362_v19 = vld [vmem:[#allocation8 + $0x3f0] sm:$0xff] }
 0x1b1   :  { %2188 = vmatpush1.bf16.msra.mxu1 %v2187_v51  ;;  %v1308_v51 = vld [vmem:[#allocation8 + $0x240] sm:$0xff] }
 0x1b2   :  { %2190 = vmatprep.subr.bf16.mxu1 %v2189_v42  ;;  %v1310_v42 = vld [vmem:[#allocation8 + $0x250] sm:$0xff] }
 0x1b3   :  { %v2279_v57 = vpack.c.bf16 %v1310_v42, %v1308_v51  ;;  %v1332_v51 = vld [vmem:[#allocation8 + $0x300] sm:$0xff]  ;;  %v1334_v42 = vld [vmem:[#allocation8 + $0x310] sm:$0xff] }
 0x1b5   :  { %2192 = vmatpush1.bf16.msra.mxu1 %v2191_v55  ;;  %v2341_v55 = vpack.c.bf16 %v1545_v17, %v1544_v29  ;;  %v1337_v17 = vld [vmem:[#allocation8 + $0x328] sm:$0xff] }
 0x1b6   :  { %2194 = vmatprep.subr.bf16.mxu1 %v2193_v16  ;;  %v1528_v16 = vld [vmem:[#allocation11 + $0x20] sm:$0xff] }
 0x1b7   :  { %v2343_v0 = vpack.c.bf16 %v1529_v56, %v1528_v16  ;;  %v1338_v16 = vld [vmem:[#allocation8 + $0x330] sm:$0xff]  ;;  %v1341_v56 = vld [vmem:[#allocation8 + $0x348] sm:$0xff] }
 0x1b9   :  { %2196 = vmatpush1.bf16.msra.mxu1 %v2195_v60  ;;  %v2281_v60 = vpack.c.bf16 %v1315_v53, %v1313_v52  ;;  %v1339_v52 = vld [vmem:[#allocation8 + $0x338] sm:$0xff]  ;;  %v2303_v53 = vpack.c.bf16 %v1334_v42, %v1332_v51  ;;  %v1536_v51 = vld [vmem:[#allocation11 + $0x60] sm:$0xff]  ;;  %v1537_v42 = vld [vmem:[#allocation11 + $0x68] sm:$0xff] }
 0x1ba   :  { %2198 = vmatprep.subr.bf16.mxu1 %v2197_v61  ;;  %v1312_v61 = vld [vmem:[#allocation8 + $0x260] sm:$0xff] }
 0x1bb   :  { %v2283_v4 = vpack.c.bf16 %v1314_v62, %v1312_v61  ;;  %v1342_v61 = vld [vmem:[#allocation8 + $0x350] sm:$0xff]  ;;  %v1345_v62 = vld [vmem:[#allocation8 + $0x368] sm:$0xff] }
 0x1bd   :  { %2200 = vmatpush1.bf16.msra.mxu1 %v2199_v1  ;;  %v2345_v1 = vpack.c.bf16 %v1547_v59, %v1546_v58 }
 0x1be   :  { %2202 = vmatprep.subr.bf16.mxu1 %v2201_v2  ;;  %v1530_v2 = vld [vmem:[#allocation11 + $0x30] sm:$0xff] }
 0x1c1   :  { %2204 = vmatpush1.bf16.msra.mxu1 %v2203_v6  ;;  %v1548_v6 = vld [vmem:[#allocation11 + $0xc0] sm:$0xff] }
 0x1c2   :  { %2334 = vmatprep.subr.bf16.mxu1 %v2333_v40  ;;  %v1329_v40 = vld [vmem:[#allocation8 + $0x2e8] sm:$0xff] }
 0x1c4   :  { %1218 = vmatmul.mubr.f32.vlgmr.msra.gmra.mrb[2].mxu1 %v2749_v33  ;;  %v725_v33 = vadd.f32 %v2757_v5, %v643_v13  ;;  %v1316_v13 = vld [vmem:[#allocation8 + $0x280] sm:$0xff] }
 0x1c5   :  { %2336 = vmatpush3.bf16.msra.mxu1 %v2335_v46  ;;  %v1328_v46 = vld [vmem:[#allocation8 + $0x2e0] sm:$0xff] }
 0x1c6   :  { %2338 = vmatprep.subr.bf16.mxu1 %v2337_v47  ;;  %v1330_v47 = vld [vmem:[#allocation8 + $0x2f0] sm:$0xff] }
 0x1c7   :  { %v2299_v29 = vpack.c.bf16 %v1330_v47, %v1328_v46 }
 0x1c9   :  { %2340 = vmatpush3.bf16.msra.mxu1 %v2339_v54  ;;  %v2305_v54 = vpack.c.bf16 %v1339_v52, %v1337_v17  ;;  %v2359_v17 = vpack.c.bf16 %v1537_v42, %v1536_v51  ;;  %v1555_v52 = vld [vmem:[#allocation11 + $0xf8] sm:$0xff] }
 0x1ca   :  { %2342 = vmatprep.subr.bf16.mxu1 %v2341_v55  ;;  %v1336_v55 = vld [vmem:[#allocation8 + $0x320] sm:$0xff] }
 0x1cb   :  { %v2307_v58 = vpack.c.bf16 %v1338_v16, %v1336_v55  ;;  %v1539_v55 = vld [vmem:[#allocation11 + $0x78] sm:$0xff] }
 0x1cd   :  { %2344 = vmatpush3.bf16.msra.mxu1 %v2343_v0  ;;  %v2313_v0 = vpack.c.bf16 %v1347_v63, %v1345_v62 }
 0x1ce   :  { %2346 = vmatprep.subr.bf16.mxu1 %v2345_v1  ;;  %v1344_v1 = vld [vmem:[#allocation8 + $0x360] sm:$0xff] }
 0x219   :  { %v935_v15 = vpop.f32.mrb[0].mxu0 }
 0x21a   :  { %v2366_v18 = vadd.f32 %v935_v15, %v723_v14  ;;  %v937_v20 = vpop.f32.mrb[1].mxu0  ;;  %v1318_v14 = vld [vmem:[#allocation8 + $0x290] sm:$0xff]  ;;  %v1323_v15 = vld [vmem:[#allocation8 + $0x2b8] sm:$0xff] }
 0x21b   :  { %v2368_v21 = vadd.f32 %v937_v20, %v725_v33  ;;  %v1321_v33 = vld [vmem:[#allocation8 + $0x2a8] sm:$0xff]  ;;  %v2349_v20 = vpack.c.bf16 %v1549_v7, %v1548_v6  ;;  %v2287_v23 = vpack.c.bf16 %v1318_v14, %v1316_v13  ;;  %v1350_v13 = vld [vmem:[#allocation8 + $0x390] sm:$0xff] }
 0x21c   :  { %v1228_v24 = vmul.f32 0.2, %v2366_v18  ;;  %vm1224_vm0 = vcmp.gt.f32.partialorder %v2366_v18, 0.0  ;;  %v2289_v26 = vpack.c.bf16 %v1323_v15, %v1321_v33  ;;  %v1353_v14 = vld [vmem:[#allocation8 + $0x3a8] sm:$0xff]  ;;  %v1355_v33 = vld [vmem:[#allocation8 + $0x3b8] sm:$0xff] }
 0x21d   :  { %v1229_v27 = vmul.f32 0.2, %v2368_v21  ;;  %vm1225_vm1 = vcmp.gt.f32.partialorder %v2368_v21, 0.0 }
 0x21e   :  { %v1232_v5 = vsel %vm1224_vm0, %v2366_v18, %v1228_v24  ;;  %v2347_v18 = vpack.c.bf16 %v1531_v3, %v1530_v2  ;;  %v1550_v24 = vld [vmem:[#allocation11 + $0xd0] sm:$0xff]  ;;  %v1349_v3 = vld [vmem:[#allocation8 + $0x388] sm:$0xff] }
 0x21f   :  { %v1233_v32 = vsel %vm1225_vm1, %v2368_v21, %v1229_v27  ;;  %v1532_v21 = vld [vmem:[#allocation11 + $0x40] sm:$0xff]  ;;  %v2353_v35 = vpack.c.bf16 %v1551_v25, %v1550_v24  ;;  %v1346_v2 = vld [vmem:[#allocation8 + $0x370] sm:$0xff] }
 0x220   :  { %1440 = vmatprep.mubr.f32.mxu0 %v1233_v32  ;;  %v1320_v27 = vld [vmem:[#allocation8 + $0x2a0] sm:$0xff]  ;;  %v1327_v32 = vld [vmem:[#allocation8 + $0x2d8] sm:$0xff]  ;;  %2348 = vmatpush3.bf16.msra.mxu1 %v2347_v18  ;;  %v2315_v6 = vpack.c.bf16 %v1346_v2, %v1344_v1  ;;  %v2321_v18 = vpack.c.bf16 %v1355_v33, %v1353_v14 }
 0x221   :  { %1441 = vmatmul.mubr.f32.vlgmr.msra.gmra.mrb[2].mxu0 %v1232_v5  ;;  %2350 = vmatprep.subr.bf16.mxu1 %v2349_v20  ;;  %v2293_v37 = vpack.c.bf16 %v1327_v32, %v1325_v31  ;;  %v1352_v20 = vld [vmem:[#allocation8 + $0x3a0] sm:$0xff]  ;;  %v1363_v31 = vld [vmem:[#allocation8 + $0x3f8] sm:$0xff] }
 0x222   :  { %2272 = vmatpush1.bf16.msra.mxu0 %v2271_v30  ;;  %v1322_v30 = vld [vmem:[#allocation8 + $0x2b0] sm:$0xff] }
 0x223   :  { %2274 = vmatprep.subr.bf16.mxu0 %v2273_v34  ;;  %v2351_v34 = vpack.c.bf16 %v1533_v22, %v1532_v21  ;;  %v2291_v5 = vpack.c.bf16 %v1322_v30, %v1320_v27  ;;  %v1354_v21 = vld [vmem:[#allocation8 + $0x3b0] sm:$0xff]  ;;  %v1357_v22 = vld [vmem:[#allocation8 + $0x3c8] sm:$0xff] }
 0x224   :  { %v2323_v24 = vpack.c.bf16 %v1354_v21, %v1352_v20  ;;  %v1358_v27 = vld [vmem:[#allocation8 + $0x3d0] sm:$0xff]  ;;  %v1361_v30 = vld [vmem:[#allocation8 + $0x3e8] sm:$0xff] }
 0x225   :  { %2352 = vmatpush3.bf16.msra.mxu1 %v2351_v34  ;;  %v2329_v34 = vpack.c.bf16 %v1363_v31, %v1361_v30 }
 0x226   :  { %2276 = vmatpush1.bf16.msra.mxu0 %v2275_v45  ;;  %2354 = vmatprep.subr.bf16.mxu1 %v2353_v35  ;;  %v2297_v45 = vpack.c.bf16 %v1331_v41, %v1329_v40  ;;  %v1360_v35 = vld [vmem:[#allocation8 + $0x3e0] sm:$0xff] }
 0x227   :  { %2278 = vmatprep.subr.bf16.mxu0 %v2277_v50  ;;  %v2301_v50 = vpack.c.bf16 %v1335_v49, %v1333_v48  ;;  %v2331_v36 = vpack.c.bf16 %v1362_v19, %v1360_v35  ;;  %v1552_v49 = vld [vmem:[#allocation11 + $0xe0] sm:$0xff] }
 0x229   :  { %2356 = vmatpush3.bf16.msra.mxu1 %v2355_v43 }
 0x22a   :  { %2280 = vmatpush1.bf16.msra.mxu0 %v2279_v57  ;;  %v1343_v57 = vld [vmem:[#allocation8 + $0x358] sm:$0xff] }
 0x22b   :  { %2282 = vmatprep.subr.bf16.mxu0 %v2281_v60  ;;  %v2309_v59 = vpack.c.bf16 %v1343_v57, %v1341_v56  ;;  %v1340_v60 = vld [vmem:[#allocation8 + $0x340] sm:$0xff] }
 0x22c   :  { %v2311_v28 = vpack.c.bf16 %v1342_v61, %v1340_v60  ;;  %v1364_v56 = vld [vmem:[#allocation10] sm:$0x3] }
 0x22d   :  { %v1369_v57 = vrot.slane %v1364_v56, %v638_v9 }
 0x22e   :  { %2284 = vmatpush1.bf16.msra.mxu0 %v2283_v4  ;;  %v1351_v4 = vld [vmem:[#allocation8 + $0x398] sm:$0xff] }
 0x22f   :  { %2286 = vmatprep.subr.bf16.mxu0 %v2285_v12  ;;  %v2317_v7 = vpack.c.bf16 %v1351_v4, %v1349_v3  ;;  %v1348_v12 = vld [vmem:[#allocation8 + $0x380] sm:$0xff] }
 0x230   :  { %v2319_v15 = vpack.c.bf16 %v1350_v13, %v1348_v12  ;;  %v1657_v3 = vld [vmem:[#allocation13] ss:$0 sm:$0xff] }
 0x232   :  { %2288 = vmatpush1.bf16.msra.mxu0 %v2287_v23  ;;  %v1359_v23 = vld [vmem:[#allocation8 + $0x3d8] sm:$0xff] }
 0x233   :  { %2290 = vmatprep.subr.bf16.mxu0 %v2289_v26  ;;  %v2325_v25 = vpack.c.bf16 %v1359_v23, %v1357_v22  ;;  %v1356_v26 = vld [vmem:[#allocation8 + $0x3c0] sm:$0xff] }
 0x234   :  { %v2327_v32 = vpack.c.bf16 %v1358_v27, %v1356_v26 }
 0x236   :  { %2292 = vmatpush1.bf16.msra.mxu0 %v2291_v5  ;;  %v646_v5 = vsub.s32 2, %v2760_v8 }
 0x237   :  { %2294 = vmatprep.subr.bf16.mxu0 %v2293_v37  ;;  %v650_v37 = vsub.s32 3, %v2760_v8 }
 0x238   :  { %v647_v38 = vrot.slane %v2763_v10, %v646_v5 }
 0x239   :  { %v651_v39 = vrot.slane %v2763_v10, %v650_v37  ;;  %v1554_v10 = vld [vmem:[#allocation11 + $0xf0] sm:$0xff] }
 0x23a   :  { %2296 = vmatpush1.bf16.msra.mxu0 %v2295_v44 }
 0x23b   :  { %2298 = vmatprep.subr.bf16.mxu0 %v2297_v45 }
 0x23e   :  { %2300 = vmatpush1.bf16.msra.mxu0 %v2299_v29  ;;  %v1553_v29 = vld [vmem:[#allocation11 + $0xe8] sm:$0xff] }
 0x23f   :  { %2302 = vmatprep.subr.bf16.mxu0 %v2301_v50  ;;  %v2357_v50 = vpack.c.bf16 %v1553_v29, %v1552_v49 }
 0x241   :  { %2358 = vmatprep.subr.bf16.mxu1 %v2357_v50 }
 0x242   :  { %2304 = vmatpush1.bf16.msra.mxu0 %v2303_v53  ;;  %2360 = vmatpush3.bf16.msra.mxu1 %v2359_v17  ;;  %v2361_v53 = vpack.c.bf16 %v1555_v52, %v1554_v10 }
 0x243   :  { %2306 = vmatprep.subr.bf16.mxu0 %v2305_v54  ;;  %v1538_v54 = vld [vmem:[#allocation11 + $0x70] sm:$0xff] }
 0x244   :  { %v2363_v16 = vpack.c.bf16 %v1539_v55, %v1538_v54  ;;  %2362 = vmatprep.subr.bf16.mxu1 %v2361_v53 }
 0x246   :  { %2308 = vmatpush1.bf16.msra.mxu0 %v2307_v58  ;;  %2364 = vmatpush3.bf16.msra.mxu1 %v2363_v16  ;;  %v1373_v58 = vrot.slane %v1364_v56, %v642_v11 }
 0x247   :  { %2310 = vmatprep.subr.bf16.mxu0 %v2309_v59 }
 0x24a   :  { %2312 = vmatpush1.bf16.msra.mxu0 %v2311_v28 }
 0x24b   :  { %2314 = vmatprep.subr.bf16.mxu0 %v2313_v0 }
 0x24e   :  { %2316 = vmatpush1.bf16.msra.mxu0 %v2315_v6 }
 0x24f   :  { %2318 = vmatprep.subr.bf16.mxu0 %v2317_v7 }
 0x252   :  { %2320 = vmatpush1.bf16.msra.mxu0 %v2319_v15 }
 0x253   :  { %2322 = vmatprep.subr.bf16.mxu0 %v2321_v18 }
 0x256   :  { %2324 = vmatpush1.bf16.msra.mxu0 %v2323_v24 }
 0x257   :  { %2326 = vmatprep.subr.bf16.mxu0 %v2325_v25 }
 0x25a   :  { %2328 = vmatpush1.bf16.msra.mxu0 %v2327_v32 }
 0x25b   :  { %2330 = vmatprep.subr.bf16.mxu0 %v2329_v34 }
 0x25e   :  { %2332 = vmatpush1.bf16.msra.mxu0 %v2331_v36 }
 0x297   :  { %v1219_v40 = vpop.f32.mrb[2].mxu1 }
 0x298   :  { %v2369_v41 = vadd.f32 %v1219_v40, %v647_v38  ;;  %v1221_v43 = vpop.f32.mrb[3].mxu1 }
 0x299   :  { %v2370_v44 = vadd.f32 %v1221_v43, %v651_v39 }
 0x29a   :  { %v1230_v45 = vmul.f32 0.2, %v2369_v41  ;;  %vm1226_vm2 = vcmp.gt.f32.partialorder %v2369_v41, 0.0 }
 0x29b   :  { %v1231_v46 = vmul.f32 0.2, %v2370_v44  ;;  %vm1227_vm3 = vcmp.gt.f32.partialorder %v2370_v44, 0.0 }
 0x29c   :  { %v1234_v48 = vsel %vm1226_vm2, %v2369_v41, %v1230_v45 }
 0x29d   :  { %v1235_v47 = vsel %vm1227_vm3, %v2370_v44, %v1231_v46 }
 0x29e   :  { %1511 = vmatprep.mubr.f32.mxu0 %v1235_v47 }
 0x29f   :  { %1512 = vmatmul.mubr.f32.vlgmr.msra.gmra.mrb[2].mxu0 %v1234_v48 }
 0x372   :  { %v1513_v59 = vpop.f32.mrb[2].mxu0 }
 0x373   :  { %v2371_v60 = vadd.f32 %v1513_v59, %v1369_v57  ;;  %v1515_v61 = vpop.f32.mrb[3].mxu0 }
 0x374   :  { %v2372_v62 = vadd.f32 %v1515_v61, %v1373_v58 }
 0x375   :  { %v1520_v63 = vmul.f32 0.2, %v2371_v60  ;;  %vm1518_vm4 = vcmp.gt.f32.partialorder %v2371_v60, 0.0 }
 0x376   :  { %v1521_v28 = vmul.f32 0.2, %v2372_v62  ;;  %vm1519_vm5 = vcmp.gt.f32.partialorder %v2372_v62, 0.0 }
 0x377   :  { %v1522_v1 = vsel %vm1518_vm4, %v2371_v60, %v1520_v63 }
 0x378   :  { %v1523_v0 = vsel %vm1519_vm5, %v2372_v62, %v1521_v28 }
 0x379   :  { %1627 = vmatprep.mubr.f32.mxu1 %v1523_v0 }
 0x37a   :  { %1628 = vmatmul.mubr.f32.vlgmr.msra.gmra.mrb[4].mxu1 %v1522_v1 }
 0x44d   :  { %v1690_v2 = vpop.f32.mrb[4].mxu1 }
 0x44e   :  { %v1691_v4 = vpop.f32.mrb[5].mxu1 }
 0x44f   :  { %v1692_v6 = vadd.f32 %v1691_v4, %v1690_v2 }
 0x451   :  { %v1630_v9 = vadd.f32 %v1692_v6, %v1657_v3 }
 0x453   :  { %v1633_v7 = vsub.f32 0.0, %v1630_v9 }
 0x455   :  { %v1634_v8 = vmul.f32 1.442695, %v1633_v7 }
 0x457   :  { %2399 = vpow2.f32 %v1634_v8 }
 0x461   :  { %v2400_v11 = vpop.eup %2399 }
 0x462   :  { %v1636_v12 = vadd.f32 1.0, %v2400_v11 }
 0x464   :  { %2401 = vrcp.f32 %v1636_v12 }
 0x46e   :  { %v2402_v13 = vpop.eup %2401 }
 0x46f   :  { %1638 = vst [vmem:[#allocation14] sm:$0xff] %v2402_v13 }
 0x470   :  { %2569 = shalt.err (!%p2566_p4)
}
 0x471   :  { %s2570_s15 = scalar_lea.hbm %s2801_s7, 128 }
 0x472   :  { %p2571_p5 = scmp.ne.s32.totalorder %s2801_s7, %s2570_s15  ;;  %p2574_p6 = scmp.lt.u32.totalorder %s2570_s15, %s2801_s7 }
 0x474   :  { %p2576_p7 = pnand %p2574_p6, %p2571_p5 }
 0x476   :  { %2579 = shalt.err (!%p2576_p7)
}
 0x477   :  { %1648 = dma.vmem_to_hbm [thread:$0]  %s1646_s13, 128, %s2801_s7, [#allocation4]  }
 0x478   :  { %2588 = dma.done.wait [#allocation4], 128  }
 0x479   :  { %2589 = vsyncadd [#allocation4], 4294967168 }
 0x47a   :  { %1652 = vsyncpa [#allocation3], 1 }
 0x47b   :  { %1653 = vsyncpa [#allocation6], 1 }
 0x47c   :  { %1654 = vsyncpa [#allocation9], 1 }
 0x47d   :  { %1655 = vsyncpa [#allocation12], 1 }
 0x47e   :  { %1656 = vsyncpa [#allocation4], 1 }

</bundles_post_ra>
